<compile_context>
chip_gen: v5e
topology: v5e:2x2
jax: 0.10.0
libtpu: 0.0.40
codegen_flags: <defaults>
</compile_context>

<pallas_src>
import math

import jax
import jax.numpy as jnp
from jax.experimental import pallas as pl
from jax.experimental.pallas import tpu as pltpu


_SQRT1_2 = 0.7071067811865476


def _erf_poly(z):
    """Abramowitz & Stegun 7.1.26 erf approximation (max abs err ~1.5e-7)."""
    a1, a2, a3 = 0.254829592, -0.284496736, 1.421413741
    a4, a5, p = -1.453152027, 1.061405429, 0.3275911
    az = jnp.abs(z)
    t = 1.0 / (1.0 + p * az)
    poly = ((((a5 * t + a4) * t + a3) * t + a2) * t + a1) * t
    y = 1.0 - poly * jnp.exp(-az * az)
    return jnp.where(z < 0.0, -y, y)


def _gelu(v):
    # Exact (erf-based) gelu, matching PyTorch F.gelu default up to ~1e-7.
    return 0.5 * v * (1.0 + _erf_poly(v * _SQRT1_2))


def pack_feedforward_params(w1, b1, w5, b5, ow, ob, *, W, C):
    """Expand the raw conv parameters into lane-dense matmul form.

    w1: (5, C, C)   1x1 conv weights, (Cin, Cout) per branch
    b1: (5, C)
    w5: (5, 5, 5, C, C)  5x5 conv weights, (branch, kh, kw, Cin, Cout)
    b5: (5, C)
    ow: (2C, C)     outCon weight (Cin=2C, Cout=C)
    ob: (C,)

    Returns (w1blk, b1row, wband, b5row, mout, obrow) where
      w1blk: (5, W*C, W*C)   block-diagonal kron(I_W, w1[i])
      wband: (25, W*C, W*C)  banded per-(branch, dh) weights: index i*5 + dh.
                             Entry [w'*C+c, w*C+o] = w5[i, dh, w'-w+2, c, o]
                             (zero outside the 5-wide band -> width padding is
                             implicit, only height needs an explicit halo).
      mout : (2*W*C, W*C)    block-diag outCon weight acting on hstack([x1, x3])
      b*row: biases tiled across W to a (1, W*C) row.
    """
    f32 = jnp.float32
    eye_w = jnp.eye(W, dtype=f32)

    w1blk = jnp.stack([jnp.kron(eye_w, w1[i].astype(f32)) for i in range(5)])

    shifts = [jnp.eye(W, W, k=2 - dw, dtype=f32) for dw in range(5)]
    bands = []
    for i in range(5):
        for dh in range(5):
            m = jnp.zeros((W * C, W * C), f32)
            for dw in range(5):
                m = m + jnp.kron(shifts[dw], w5[i, dh, dw].astype(f32))
            bands.append(m)
    wband = jnp.stack(bands)                       # (25, W*C, W*C)

    mout = jnp.concatenate(
        [jnp.kron(eye_w, ow[:C].astype(f32)),
         jnp.kron(eye_w, ow[C:].astype(f32))], axis=0)   # (2*W*C, W*C)

    b1row = jnp.tile(b1.astype(f32), (1, W)).reshape(5, 1, W * C)
    b5row = jnp.tile(b5.astype(f32), (1, W)).reshape(5, 1, W * C)
    obrow = jnp.tile(ob.astype(f32), W).reshape(1, W * C)

    return w1blk, b1row, wband, b5row, mout, obrow


def build_feedforward(B, H, W, C):
    """Returns apply(x_nhwc, w1blk, b1row, wband, b5row, mout, obrow) -> y_nhwc."""
    WC = W * C
    Hp = H + 4

    def kernel(x_ref, w1_ref, b1_ref, wb_ref, b5_ref, mo_ref, ob_ref,
               o_ref, pad_ref):
        # Zero only the 4 halo rows, once per grid step (safe under "parallel":
        # no cross-step state).  The interior rows are fully overwritten by
        # every conv5 call below.
        pad_ref[0:2, :] = jnp.zeros((2, WC), jnp.float32)
        pad_ref[H + 2:H + 4, :] = jnp.zeros((2, WC), jnp.float32)

        x = x_ref[...]                                   # (H, W*C) f32

        def conv1(v, i):
            return (jnp.dot(v, w1_ref[i], preferred_element_type=jnp.float32)
                    + b1_ref[i])

        def conv5(v, i):
            # Height halo via scratch; width halo is folded into the banded
            # weights, so the store is full-lane-width.
            pad_ref[2:2 + H, :] = v
            acc = jnp.zeros((H, WC), jnp.float32)
            for dh in range(5):                          # static unroll (5 dots)
                acc = acc + jnp.dot(pad_ref[dh:dh + H, :], wb_ref[i * 5 + dh],
                                    preferred_element_type=jnp.float32)
            return acc + b5_ref[i]

        y1 = conv5(conv1(x, 0), 0)
        y2 = conv5(conv1(x, 1), 1)
        y3 = conv5(conv1(x, 2), 2)
        y1 = y2 + conv5(conv1(_gelu(y1) * y2, 3), 3)
        y3 = y2 + conv5(conv1(_gelu(y3) * y2, 4), 4)

        # outCon on channel-concat == single (H, 2*W*C) @ (2*W*C, W*C) matmul.
        cat = jnp.concatenate([y1, y3], axis=1)          # (H, 2*W*C)
        out = jnp.dot(cat, mo_ref[...],
                      preferred_element_type=jnp.float32) + ob_ref[...]
        o_ref[...] = out.astype(o_ref.dtype)

    def full(shape):
        return pl.BlockSpec(shape, lambda b: (0,) * len(shape))

    grid_spec = pltpu.PrefetchScalarGridSpec(
        num_scalar_prefetch=0,
        grid=(B,),
        in_specs=[
            pl.BlockSpec((H, WC), lambda b: (b, 0)),   # x, contiguous per-batch
            full((5, WC, WC)),                         # w1blk
            full((5, 1, WC)),                          # b1row
            full((25, WC, WC)),                        # wband (branch*5 + dh)
            full((5, 1, WC)),                          # b5row
            full((2 * WC, WC)),                        # mout
            full((1, WC)),                             # obrow
        ],
        out_specs=pl.BlockSpec((H, WC), lambda b: (b, 0)),
        scratch_shapes=[pltpu.VMEM((Hp, WC), jnp.float32)],
    )

    ff_call = pl.pallas_call(
        kernel,
        out_shape=jax.ShapeDtypeStruct((B * H, WC), jnp.float32),
        grid_spec=grid_spec,
        compiler_params=pltpu.CompilerParams(
            dimension_semantics=("parallel",)),   # batch steps are independent
    )

    def apply(x_nhwc, w1blk, b1row, wband, b5row, mout, obrow):
        x2d = x_nhwc.astype(jnp.float32).reshape(B * H, WC)
        out2d = ff_call(x2d, w1blk, b1row, wband, b5row, mout, obrow)
        return out2d.reshape(B, H, W, C)

    return apply


def feedforward_ref(x, w1, b1, w5, b5, ow, ob):
    """Pure-JAX NHWC reference (exact erf gelu, HIGHEST precision)."""
    P = jax.lax.Precision.HIGHEST

    def c1(v, i):
        return jnp.einsum('bhwc,co->bhwo', v, w1[i], precision=P) + b1[i]

    def c5(v, i):
        y = jax.lax.conv_general_dilated(
            v, w5[i], (1, 1), [(2, 2), (2, 2)],
            dimension_numbers=('NHWC', 'HWIO', 'NHWC'), precision=P)
        return y + b5[i]

    def g(t):
        return jax.nn.gelu(t, approximate=False)

    x1 = c5(c1(x, 0), 0)
    x2 = c5(c1(x, 1), 1)
    x3 = c5(c1(x, 2), 2)
    x1 = x2 + c5(c1(g(x1) * x2, 3), 3)
    x3 = x2 + c5(c1(g(x3) * x2, 4), 4)
    cat = jnp.concatenate([x1, x3], axis=-1)
    return jnp.einsum('bhwc,co->bhwo', cat, ow, precision=P) + ob


if __name__ == "__main__":
    B, C, H, W = 2, 4, 16, 16   # dim = 4, bias = True

    key = jax.random.PRNGKey(0)
    keys = jax.random.split(key, 7)

    # Deterministic synthetic parameters (PyTorch-like fan_in init scale).
    x_nchw = jax.random.normal(keys[0], (B, C, H, W), dtype=jnp.float32)
    x = jnp.transpose(x_nchw, (0, 2, 3, 1))            # NCHW -> NHWC

    s1 = 1.0 / math.sqrt(C)
    s5 = 1.0 / math.sqrt(C * 25)
    so = 1.0 / math.sqrt(2 * C)

    w1 = jax.random.normal(keys[1], (5, C, C), dtype=jnp.float32) * s1
    b1 = jax.random.normal(keys[2], (5, C), dtype=jnp.float32) * s1
    w5 = jax.random.normal(keys[3], (5, 5, 5, C, C), dtype=jnp.float32) * s5
    b5 = jax.random.normal(keys[4], (5, C), dtype=jnp.float32) * s5
    ow = jax.random.normal(keys[5], (2 * C, C), dtype=jnp.float32) * so
    ob = jax.random.normal(keys[6], (C,), dtype=jnp.float32) * so

    packed = pack_feedforward_params(w1, b1, w5, b5, ow, ob, W=W, C=C)
    ff = build_feedforward(B, H, W, C)
    out = jax.block_until_ready(ff(x, *packed))

    ref = feedforward_ref(x, w1, b1, w5, b5, ow, ob)
    assert out.shape == (B, H, W, C)
    err = float(jnp.max(jnp.abs(out - ref)))
    assert err < 5e-4, err

    print("KERNEL_OK")
</pallas_src>

<mosaic_0001>
module attributes {stable_mosaic.version = 11 : i64} {
  func.func @kernel(%arg0: i32, %arg1: memref<16x64xf32, #tpu.memory_space<vmem>>, %arg2: memref<5x64x64xf32, #tpu.memory_space<vmem>>, %arg3: memref<5x1x64xf32, #tpu.memory_space<vmem>>, %arg4: memref<25x64x64xf32, #tpu.memory_space<vmem>>, %arg5: memref<5x1x64xf32, #tpu.memory_space<vmem>>, %arg6: memref<128x64xf32, #tpu.memory_space<vmem>>, %arg7: memref<1x64xf32, #tpu.memory_space<vmem>>, %arg8: memref<16x64xf32, #tpu.memory_space<vmem>>, %arg9: memref<20x64xf32, #tpu.memory_space<vmem>>) attributes {dimension_semantics = [#tpu.dimension_semantics<parallel>], iteration_bounds = array<i64: 2>, scalar_prefetch = 0 : i64, scratch_operands = 1 : i64, tpu.core_type = #tpu.core_type<tc>, window_params = [{transform_indices = @transform_0, window_bounds = array<i64: 16, 64>}, {pipeline_mode = #tpu.pipeline_mode<synchronous>, transform_indices = @transform_1, window_bounds = array<i64: 5, 64, 64>}, {pipeline_mode = #tpu.pipeline_mode<synchronous>, transform_indices = @transform_2, window_bounds = array<i64: 5, 1, 64>}, {pipeline_mode = #tpu.pipeline_mode<synchronous>, transform_indices = @transform_3, window_bounds = array<i64: 25, 64, 64>}, {pipeline_mode = #tpu.pipeline_mode<synchronous>, transform_indices = @transform_4, window_bounds = array<i64: 5, 1, 64>}, {pipeline_mode = #tpu.pipeline_mode<synchronous>, transform_indices = @transform_5, window_bounds = array<i64: 128, 64>}, {pipeline_mode = #tpu.pipeline_mode<synchronous>, transform_indices = @transform_6, window_bounds = array<i64: 1, 64>}, {transform_indices = @transform_7, window_bounds = array<i64: 16, 64>}]} {
    %cst = arith.constant 0.000000e+00 : f32
    %0 = vector.broadcast %cst : f32 to vector<2x64xf32>
    %c0 = arith.constant 0 : index
    %c0_0 = arith.constant 0 : index
    %1 = vector.load %arg9[%c0, %c0_0] : memref<20x64xf32, #tpu.memory_space<vmem>>, vector<2x64xf32>
    tpu.vector_store %arg9[%c0, %c0_0], %0 {strides = array<i32>} : memref<20x64xf32, #tpu.memory_space<vmem>>, vector<2x64xf32>,
    %cst_1 = arith.constant 0.000000e+00 : f32
    %2 = vector.broadcast %cst_1 : f32 to vector<2x64xf32>
    %c18 = arith.constant 18 : index
    %c0_2 = arith.constant 0 : index
    %3 = vector.load %arg9[%c18, %c0_2] : memref<20x64xf32, #tpu.memory_space<vmem>>, vector<2x64xf32>
    tpu.vector_store %arg9[%c18, %c0_2], %2 {strides = array<i32>} : memref<20x64xf32, #tpu.memory_space<vmem>>, vector<2x64xf32>,
    %c0_3 = arith.constant 0 : index
    %c0_4 = arith.constant 0 : index
    %4 = vector.load %arg1[%c0_3, %c0_4] : memref<16x64xf32, #tpu.memory_space<vmem>>, vector<16x64xf32>
    %c0_5 = arith.constant 0 : index
    %c0_6 = arith.constant 0 : index
    %c0_7 = arith.constant 0 : index
    %5 = vector.load %arg2[%c0_5, %c0_6, %c0_7] : memref<5x64x64xf32, #tpu.memory_space<vmem>>, vector<1x64x64xf32>
    %6 = vector.shape_cast %5 : vector<1x64x64xf32> to vector<64x64xf32>
    %cst_8 = arith.constant dense<0.000000e+00> : vector<16x64xf32>
    %7 = tpu.matmul %4, %6, %cst_8 {dimension_numbers = #tpu.dot_dimension_numbers<[1], [0], [0], [1], [0, 0, 1, 1], [], []>} : vector<16x64xf32>, vector<64x64xf32>, vector<16x64xf32> -> vector<16x64xf32>
    %c0_9 = arith.constant 0 : index
    %c0_10 = arith.constant 0 : index
    %c0_11 = arith.constant 0 : index
    %8 = vector.load %arg3[%c0_9, %c0_10, %c0_11] : memref<5x1x64xf32, #tpu.memory_space<vmem>>, vector<1x1x64xf32>
    %9 = vector.shape_cast %8 : vector<1x1x64xf32> to vector<1x64xf32>
    %10 = vector.broadcast %9 : vector<1x64xf32> to vector<16x64xf32>
    %11 = arith.addf %7, %10 : vector<16x64xf32>
    %c2 = arith.constant 2 : index
    %c0_12 = arith.constant 0 : index
    %12 = vector.load %arg9[%c2, %c0_12] : memref<20x64xf32, #tpu.memory_space<vmem>>, vector<16x64xf32>
    tpu.vector_store %arg9[%c2, %c0_12], %11 {strides = array<i32>} : memref<20x64xf32, #tpu.memory_space<vmem>>, vector<16x64xf32>,
    %cst_13 = arith.constant 0.000000e+00 : f32
    %13 = vector.broadcast %cst_13 : f32 to vector<16x64xf32>
    %c0_14 = arith.constant 0 : index
    %c0_15 = arith.constant 0 : index
    %14 = vector.load %arg9[%c0_14, %c0_15] : memref<20x64xf32, #tpu.memory_space<vmem>>, vector<16x64xf32>
    %c0_16 = arith.constant 0 : index
    %c0_17 = arith.constant 0 : index
    %c0_18 = arith.constant 0 : index
    %15 = vector.load %arg4[%c0_16, %c0_17, %c0_18] : memref<25x64x64xf32, #tpu.memory_space<vmem>>, vector<1x64x64xf32>
    %16 = vector.shape_cast %15 : vector<1x64x64xf32> to vector<64x64xf32>
    %cst_19 = arith.constant dense<0.000000e+00> : vector<16x64xf32>
    %17 = tpu.matmul %14, %16, %cst_19 {dimension_numbers = #tpu.dot_dimension_numbers<[1], [0], [0], [1], [0, 0, 1, 1], [], []>} : vector<16x64xf32>, vector<64x64xf32>, vector<16x64xf32> -> vector<16x64xf32>
    %18 = arith.addf %13, %17 : vector<16x64xf32>
    %c1 = arith.constant 1 : index
    %c0_20 = arith.constant 0 : index
    %19 = vector.load %arg9[%c1, %c0_20] : memref<20x64xf32, #tpu.memory_space<vmem>>, vector<16x64xf32>
    %c1_21 = arith.constant 1 : index
    %c0_22 = arith.constant 0 : index
    %c0_23 = arith.constant 0 : index
    %20 = vector.load %arg4[%c1_21, %c0_22, %c0_23] : memref<25x64x64xf32, #tpu.memory_space<vmem>>, vector<1x64x64xf32>
    %21 = vector.shape_cast %20 : vector<1x64x64xf32> to vector<64x64xf32>
    %cst_24 = arith.constant dense<0.000000e+00> : vector<16x64xf32>
    %22 = tpu.matmul %19, %21, %cst_24 {dimension_numbers = #tpu.dot_dimension_numbers<[1], [0], [0], [1], [0, 0, 1, 1], [], []>} : vector<16x64xf32>, vector<64x64xf32>, vector<16x64xf32> -> vector<16x64xf32>
    %23 = arith.addf %18, %22 : vector<16x64xf32>
    %c2_25 = arith.constant 2 : index
    %c0_26 = arith.constant 0 : index
    %24 = vector.load %arg9[%c2_25, %c0_26] : memref<20x64xf32, #tpu.memory_space<vmem>>, vector<16x64xf32>
    %c2_27 = arith.constant 2 : index
    %c0_28 = arith.constant 0 : index
    %c0_29 = arith.constant 0 : index
    %25 = vector.load %arg4[%c2_27, %c0_28, %c0_29] : memref<25x64x64xf32, #tpu.memory_space<vmem>>, vector<1x64x64xf32>
    %26 = vector.shape_cast %25 : vector<1x64x64xf32> to vector<64x64xf32>
    %cst_30 = arith.constant dense<0.000000e+00> : vector<16x64xf32>
    %27 = tpu.matmul %24, %26, %cst_30 {dimension_numbers = #tpu.dot_dimension_numbers<[1], [0], [0], [1], [0, 0, 1, 1], [], []>} : vector<16x64xf32>, vector<64x64xf32>, vector<16x64xf32> -> vector<16x64xf32>
    %28 = arith.addf %23, %27 : vector<16x64xf32>
    %c3 = arith.constant 3 : index
    %c0_31 = arith.constant 0 : index
    %29 = vector.load %arg9[%c3, %c0_31] : memref<20x64xf32, #tpu.memory_space<vmem>>, vector<16x64xf32>
    %c3_32 = arith.constant 3 : index
    %c0_33 = arith.constant 0 : index
    %c0_34 = arith.constant 0 : index
    %30 = vector.load %arg4[%c3_32, %c0_33, %c0_34] : memref<25x64x64xf32, #tpu.memory_space<vmem>>, vector<1x64x64xf32>
    %31 = vector.shape_cast %30 : vector<1x64x64xf32> to vector<64x64xf32>
    %cst_35 = arith.constant dense<0.000000e+00> : vector<16x64xf32>
    %32 = tpu.matmul %29, %31, %cst_35 {dimension_numbers = #tpu.dot_dimension_numbers<[1], [0], [0], [1], [0, 0, 1, 1], [], []>} : vector<16x64xf32>, vector<64x64xf32>, vector<16x64xf32> -> vector<16x64xf32>
    %33 = arith.addf %28, %32 : vector<16x64xf32>
    %c4 = arith.constant 4 : index
    %c0_36 = arith.constant 0 : index
    %34 = vector.load %arg9[%c4, %c0_36] : memref<20x64xf32, #tpu.memory_space<vmem>>, vector<16x64xf32>
    %c4_37 = arith.constant 4 : index
    %c0_38 = arith.constant 0 : index
    %c0_39 = arith.constant 0 : index
    %35 = vector.load %arg4[%c4_37, %c0_38, %c0_39] : memref<25x64x64xf32, #tpu.memory_space<vmem>>, vector<1x64x64xf32>
    %36 = vector.shape_cast %35 : vector<1x64x64xf32> to vector<64x64xf32>
    %cst_40 = arith.constant dense<0.000000e+00> : vector<16x64xf32>
    %37 = tpu.matmul %34, %36, %cst_40 {dimension_numbers = #tpu.dot_dimension_numbers<[1], [0], [0], [1], [0, 0, 1, 1], [], []>} : vector<16x64xf32>, vector<64x64xf32>, vector<16x64xf32> -> vector<16x64xf32>
    %38 = arith.addf %33, %37 : vector<16x64xf32>
    %c0_41 = arith.constant 0 : index
    %c0_42 = arith.constant 0 : index
    %c0_43 = arith.constant 0 : index
    %39 = vector.load %arg5[%c0_41, %c0_42, %c0_43] : memref<5x1x64xf32, #tpu.memory_space<vmem>>, vector<1x1x64xf32>
    %40 = vector.shape_cast %39 : vector<1x1x64xf32> to vector<1x64xf32>
    %41 = vector.broadcast %40 : vector<1x64xf32> to vector<16x64xf32>
    %42 = arith.addf %38, %41 : vector<16x64xf32>
    %c1_44 = arith.constant 1 : index
    %c0_45 = arith.constant 0 : index
    %c0_46 = arith.constant 0 : index
    %43 = vector.load %arg2[%c1_44, %c0_45, %c0_46] : memref<5x64x64xf32, #tpu.memory_space<vmem>>, vector<1x64x64xf32>
    %44 = vector.shape_cast %43 : vector<1x64x64xf32> to vector<64x64xf32>
    %cst_47 = arith.constant dense<0.000000e+00> : vector<16x64xf32>
    %45 = tpu.matmul %4, %44, %cst_47 {dimension_numbers = #tpu.dot_dimension_numbers<[1], [0], [0], [1], [0, 0, 1, 1], [], []>} : vector<16x64xf32>, vector<64x64xf32>, vector<16x64xf32> -> vector<16x64xf32>
    %c1_48 = arith.constant 1 : index
    %c0_49 = arith.constant 0 : index
    %c0_50 = arith.constant 0 : index
    %46 = vector.load %arg3[%c1_48, %c0_49, %c0_50] : memref<5x1x64xf32, #tpu.memory_space<vmem>>, vector<1x1x64xf32>
    %47 = vector.shape_cast %46 : vector<1x1x64xf32> to vector<1x64xf32>
    %48 = vector.broadcast %47 : vector<1x64xf32> to vector<16x64xf32>
    %49 = arith.addf %45, %48 : vector<16x64xf32>
    %c2_51 = arith.constant 2 : index
    %c0_52 = arith.constant 0 : index
    %50 = vector.load %arg9[%c2_51, %c0_52] : memref<20x64xf32, #tpu.memory_space<vmem>>, vector<16x64xf32>
    tpu.vector_store %arg9[%c2_51, %c0_52], %49 {strides = array<i32>} : memref<20x64xf32, #tpu.memory_space<vmem>>, vector<16x64xf32>,
    %cst_53 = arith.constant 0.000000e+00 : f32
    %51 = vector.broadcast %cst_53 : f32 to vector<16x64xf32>
    %c0_54 = arith.constant 0 : index
    %c0_55 = arith.constant 0 : index
    %52 = vector.load %arg9[%c0_54, %c0_55] : memref<20x64xf32, #tpu.memory_space<vmem>>, vector<16x64xf32>
    %c5 = arith.constant 5 : index
    %c0_56 = arith.constant 0 : index
    %c0_57 = arith.constant 0 : index
    %53 = vector.load %arg4[%c5, %c0_56, %c0_57] : memref<25x64x64xf32, #tpu.memory_space<vmem>>, vector<1x64x64xf32>
    %54 = vector.shape_cast %53 : vector<1x64x64xf32> to vector<64x64xf32>
    %cst_58 = arith.constant dense<0.000000e+00> : vector<16x64xf32>
    %55 = tpu.matmul %52, %54, %cst_58 {dimension_numbers = #tpu.dot_dimension_numbers<[1], [0], [0], [1], [0, 0, 1, 1], [], []>} : vector<16x64xf32>, vector<64x64xf32>, vector<16x64xf32> -> vector<16x64xf32>
    %56 = arith.addf %51, %55 : vector<16x64xf32>
    %c1_59 = arith.constant 1 : index
    %c0_60 = arith.constant 0 : index
    %57 = vector.load %arg9[%c1_59, %c0_60] : memref<20x64xf32, #tpu.memory_space<vmem>>, vector<16x64xf32>
    %c6 = arith.constant 6 : index
    %c0_61 = arith.constant 0 : index
    %c0_62 = arith.constant 0 : index
    %58 = vector.load %arg4[%c6, %c0_61, %c0_62] : memref<25x64x64xf32, #tpu.memory_space<vmem>>, vector<1x64x64xf32>
    %59 = vector.shape_cast %58 : vector<1x64x64xf32> to vector<64x64xf32>
    %cst_63 = arith.constant dense<0.000000e+00> : vector<16x64xf32>
    %60 = tpu.matmul %57, %59, %cst_63 {dimension_numbers = #tpu.dot_dimension_numbers<[1], [0], [0], [1], [0, 0, 1, 1], [], []>} : vector<16x64xf32>, vector<64x64xf32>, vector<16x64xf32> -> vector<16x64xf32>
    %61 = arith.addf %56, %60 : vector<16x64xf32>
    %c2_64 = arith.constant 2 : index
    %c0_65 = arith.constant 0 : index
    %62 = vector.load %arg9[%c2_64, %c0_65] : memref<20x64xf32, #tpu.memory_space<vmem>>, vector<16x64xf32>
    %c7 = arith.constant 7 : index
    %c0_66 = arith.constant 0 : index
    %c0_67 = arith.constant 0 : index
    %63 = vector.load %arg4[%c7, %c0_66, %c0_67] : memref<25x64x64xf32, #tpu.memory_space<vmem>>, vector<1x64x64xf32>
    %64 = vector.shape_cast %63 : vector<1x64x64xf32> to vector<64x64xf32>
    %cst_68 = arith.constant dense<0.000000e+00> : vector<16x64xf32>
    %65 = tpu.matmul %62, %64, %cst_68 {dimension_numbers = #tpu.dot_dimension_numbers<[1], [0], [0], [1], [0, 0, 1, 1], [], []>} : vector<16x64xf32>, vector<64x64xf32>, vector<16x64xf32> -> vector<16x64xf32>
    %66 = arith.addf %61, %65 : vector<16x64xf32>
    %c3_69 = arith.constant 3 : index
    %c0_70 = arith.constant 0 : index
    %67 = vector.load %arg9[%c3_69, %c0_70] : memref<20x64xf32, #tpu.memory_space<vmem>>, vector<16x64xf32>
    %c8 = arith.constant 8 : index
    %c0_71 = arith.constant 0 : index
    %c0_72 = arith.constant 0 : index
    %68 = vector.load %arg4[%c8, %c0_71, %c0_72] : memref<25x64x64xf32, #tpu.memory_space<vmem>>, vector<1x64x64xf32>
    %69 = vector.shape_cast %68 : vector<1x64x64xf32> to vector<64x64xf32>
    %cst_73 = arith.constant dense<0.000000e+00> : vector<16x64xf32>
    %70 = tpu.matmul %67, %69, %cst_73 {dimension_numbers = #tpu.dot_dimension_numbers<[1], [0], [0], [1], [0, 0, 1, 1], [], []>} : vector<16x64xf32>, vector<64x64xf32>, vector<16x64xf32> -> vector<16x64xf32>
    %71 = arith.addf %66, %70 : vector<16x64xf32>
    %c4_74 = arith.constant 4 : index
    %c0_75 = arith.constant 0 : index
    %72 = vector.load %arg9[%c4_74, %c0_75] : memref<20x64xf32, #tpu.memory_space<vmem>>, vector<16x64xf32>
    %c9 = arith.constant 9 : index
    %c0_76 = arith.constant 0 : index
    %c0_77 = arith.constant 0 : index
    %73 = vector.load %arg4[%c9, %c0_76, %c0_77] : memref<25x64x64xf32, #tpu.memory_space<vmem>>, vector<1x64x64xf32>
    %74 = vector.shape_cast %73 : vector<1x64x64xf32> to vector<64x64xf32>
    %cst_78 = arith.constant dense<0.000000e+00> : vector<16x64xf32>
    %75 = tpu.matmul %72, %74, %cst_78 {dimension_numbers = #tpu.dot_dimension_numbers<[1], [0], [0], [1], [0, 0, 1, 1], [], []>} : vector<16x64xf32>, vector<64x64xf32>, vector<16x64xf32> -> vector<16x64xf32>
    %76 = arith.addf %71, %75 : vector<16x64xf32>
    %c1_79 = arith.constant 1 : index
    %c0_80 = arith.constant 0 : index
    %c0_81 = arith.constant 0 : index
    %77 = vector.load %arg5[%c1_79, %c0_80, %c0_81] : memref<5x1x64xf32, #tpu.memory_space<vmem>>, vector<1x1x64xf32>
    %78 = vector.shape_cast %77 : vector<1x1x64xf32> to vector<1x64xf32>
    %79 = vector.broadcast %78 : vector<1x64xf32> to vector<16x64xf32>
    %80 = arith.addf %76, %79 : vector<16x64xf32>
    %c2_82 = arith.constant 2 : index
    %c0_83 = arith.constant 0 : index
    %c0_84 = arith.constant 0 : index
    %81 = vector.load %arg2[%c2_82, %c0_83, %c0_84] : memref<5x64x64xf32, #tpu.memory_space<vmem>>, vector<1x64x64xf32>
    %82 = vector.shape_cast %81 : vector<1x64x64xf32> to vector<64x64xf32>
    %cst_85 = arith.constant dense<0.000000e+00> : vector<16x64xf32>
    %83 = tpu.matmul %4, %82, %cst_85 {dimension_numbers = #tpu.dot_dimension_numbers<[1], [0], [0], [1], [0, 0, 1, 1], [], []>} : vector<16x64xf32>, vector<64x64xf32>, vector<16x64xf32> -> vector<16x64xf32>
    %c2_86 = arith.constant 2 : index
    %c0_87 = arith.constant 0 : index
    %c0_88 = arith.constant 0 : index
    %84 = vector.load %arg3[%c2_86, %c0_87, %c0_88] : memref<5x1x64xf32, #tpu.memory_space<vmem>>, vector<1x1x64xf32>
    %85 = vector.shape_cast %84 : vector<1x1x64xf32> to vector<1x64xf32>
    %86 = vector.broadcast %85 : vector<1x64xf32> to vector<16x64xf32>
    %87 = arith.addf %83, %86 : vector<16x64xf32>
    %c2_89 = arith.constant 2 : index
    %c0_90 = arith.constant 0 : index
    %88 = vector.load %arg9[%c2_89, %c0_90] : memref<20x64xf32, #tpu.memory_space<vmem>>, vector<16x64xf32>
    tpu.vector_store %arg9[%c2_89, %c0_90], %87 {strides = array<i32>} : memref<20x64xf32, #tpu.memory_space<vmem>>, vector<16x64xf32>,
    %cst_91 = arith.constant 0.000000e+00 : f32
    %89 = vector.broadcast %cst_91 : f32 to vector<16x64xf32>
    %c0_92 = arith.constant 0 : index
    %c0_93 = arith.constant 0 : index
    %90 = vector.load %arg9[%c0_92, %c0_93] : memref<20x64xf32, #tpu.memory_space<vmem>>, vector<16x64xf32>
    %c10 = arith.constant 10 : index
    %c0_94 = arith.constant 0 : index
    %c0_95 = arith.constant 0 : index
    %91 = vector.load %arg4[%c10, %c0_94, %c0_95] : memref<25x64x64xf32, #tpu.memory_space<vmem>>, vector<1x64x64xf32>
    %92 = vector.shape_cast %91 : vector<1x64x64xf32> to vector<64x64xf32>
    %cst_96 = arith.constant dense<0.000000e+00> : vector<16x64xf32>
    %93 = tpu.matmul %90, %92, %cst_96 {dimension_numbers = #tpu.dot_dimension_numbers<[1], [0], [0], [1], [0, 0, 1, 1], [], []>} : vector<16x64xf32>, vector<64x64xf32>, vector<16x64xf32> -> vector<16x64xf32>
    %94 = arith.addf %89, %93 : vector<16x64xf32>
    %c1_97 = arith.constant 1 : index
    %c0_98 = arith.constant 0 : index
    %95 = vector.load %arg9[%c1_97, %c0_98] : memref<20x64xf32, #tpu.memory_space<vmem>>, vector<16x64xf32>
    %c11 = arith.constant 11 : index
    %c0_99 = arith.constant 0 : index
    %c0_100 = arith.constant 0 : index
    %96 = vector.load %arg4[%c11, %c0_99, %c0_100] : memref<25x64x64xf32, #tpu.memory_space<vmem>>, vector<1x64x64xf32>
    %97 = vector.shape_cast %96 : vector<1x64x64xf32> to vector<64x64xf32>
    %cst_101 = arith.constant dense<0.000000e+00> : vector<16x64xf32>
    %98 = tpu.matmul %95, %97, %cst_101 {dimension_numbers = #tpu.dot_dimension_numbers<[1], [0], [0], [1], [0, 0, 1, 1], [], []>} : vector<16x64xf32>, vector<64x64xf32>, vector<16x64xf32> -> vector<16x64xf32>
    %99 = arith.addf %94, %98 : vector<16x64xf32>
    %c2_102 = arith.constant 2 : index
    %c0_103 = arith.constant 0 : index
    %100 = vector.load %arg9[%c2_102, %c0_103] : memref<20x64xf32, #tpu.memory_space<vmem>>, vector<16x64xf32>
    %c12 = arith.constant 12 : index
    %c0_104 = arith.constant 0 : index
    %c0_105 = arith.constant 0 : index
    %101 = vector.load %arg4[%c12, %c0_104, %c0_105] : memref<25x64x64xf32, #tpu.memory_space<vmem>>, vector<1x64x64xf32>
    %102 = vector.shape_cast %101 : vector<1x64x64xf32> to vector<64x64xf32>
    %cst_106 = arith.constant dense<0.000000e+00> : vector<16x64xf32>
    %103 = tpu.matmul %100, %102, %cst_106 {dimension_numbers = #tpu.dot_dimension_numbers<[1], [0], [0], [1], [0, 0, 1, 1], [], []>} : vector<16x64xf32>, vector<64x64xf32>, vector<16x64xf32> -> vector<16x64xf32>
    %104 = arith.addf %99, %103 : vector<16x64xf32>
    %c3_107 = arith.constant 3 : index
    %c0_108 = arith.constant 0 : index
    %105 = vector.load %arg9[%c3_107, %c0_108] : memref<20x64xf32, #tpu.memory_space<vmem>>, vector<16x64xf32>
    %c13 = arith.constant 13 : index
    %c0_109 = arith.constant 0 : index
    %c0_110 = arith.constant 0 : index
    %106 = vector.load %arg4[%c13, %c0_109, %c0_110] : memref<25x64x64xf32, #tpu.memory_space<vmem>>, vector<1x64x64xf32>
    %107 = vector.shape_cast %106 : vector<1x64x64xf32> to vector<64x64xf32>
    %cst_111 = arith.constant dense<0.000000e+00> : vector<16x64xf32>
    %108 = tpu.matmul %105, %107, %cst_111 {dimension_numbers = #tpu.dot_dimension_numbers<[1], [0], [0], [1], [0, 0, 1, 1], [], []>} : vector<16x64xf32>, vector<64x64xf32>, vector<16x64xf32> -> vector<16x64xf32>
    %109 = arith.addf %104, %108 : vector<16x64xf32>
    %c4_112 = arith.constant 4 : index
    %c0_113 = arith.constant 0 : index
    %110 = vector.load %arg9[%c4_112, %c0_113] : memref<20x64xf32, #tpu.memory_space<vmem>>, vector<16x64xf32>
    %c14 = arith.constant 14 : index
    %c0_114 = arith.constant 0 : index
    %c0_115 = arith.constant 0 : index
    %111 = vector.load %arg4[%c14, %c0_114, %c0_115] : memref<25x64x64xf32, #tpu.memory_space<vmem>>, vector<1x64x64xf32>
    %112 = vector.shape_cast %111 : vector<1x64x64xf32> to vector<64x64xf32>
    %cst_116 = arith.constant dense<0.000000e+00> : vector<16x64xf32>
    %113 = tpu.matmul %110, %112, %cst_116 {dimension_numbers = #tpu.dot_dimension_numbers<[1], [0], [0], [1], [0, 0, 1, 1], [], []>} : vector<16x64xf32>, vector<64x64xf32>, vector<16x64xf32> -> vector<16x64xf32>
    %114 = arith.addf %109, %113 : vector<16x64xf32>
    %c2_117 = arith.constant 2 : index
    %c0_118 = arith.constant 0 : index
    %c0_119 = arith.constant 0 : index
    %115 = vector.load %arg5[%c2_117, %c0_118, %c0_119] : memref<5x1x64xf32, #tpu.memory_space<vmem>>, vector<1x1x64xf32>
    %116 = vector.shape_cast %115 : vector<1x1x64xf32> to vector<1x64xf32>
    %117 = vector.broadcast %116 : vector<1x64xf32> to vector<16x64xf32>
    %118 = arith.addf %114, %117 : vector<16x64xf32>
    %cst_120 = arith.constant 5.000000e-01 : f32
    %119 = vector.broadcast %cst_120 : f32 to vector<16x64xf32>
    %120 = arith.mulf %119, %42 : vector<16x64xf32>
    %cst_121 = arith.constant 0.707106769 : f32
    %121 = vector.broadcast %cst_121 : f32 to vector<16x64xf32>
    %122 = arith.mulf %42, %121 : vector<16x64xf32>
    %123 = math.absf %122 : vector<16x64xf32>
    %cst_122 = arith.constant 0.327591091 : f32
    %124 = vector.broadcast %cst_122 : f32 to vector<16x64xf32>
    %125 = arith.mulf %124, %123 : vector<16x64xf32>
    %cst_123 = arith.constant 1.000000e+00 : f32
    %126 = vector.broadcast %cst_123 : f32 to vector<16x64xf32>
    %127 = arith.addf %126, %125 : vector<16x64xf32>
    %cst_124 = arith.constant 1.000000e+00 : f32
    %128 = vector.broadcast %cst_124 : f32 to vector<16x64xf32>
    %129 = arith.divf %128, %127 : vector<16x64xf32>
    %cst_125 = arith.constant 1.06140542 : f32
    %130 = vector.broadcast %cst_125 : f32 to vector<16x64xf32>
    %131 = arith.mulf %130, %129 : vector<16x64xf32>
    %cst_126 = arith.constant -1.45315206 : f32
    %132 = vector.broadcast %cst_126 : f32 to vector<16x64xf32>
    %133 = arith.addf %131, %132 : vector<16x64xf32>
    %134 = arith.mulf %133, %129 : vector<16x64xf32>
    %cst_127 = arith.constant 1.42141378 : f32
    %135 = vector.broadcast %cst_127 : f32 to vector<16x64xf32>
    %136 = arith.addf %134, %135 : vector<16x64xf32>
    %137 = arith.mulf %136, %129 : vector<16x64xf32>
    %cst_128 = arith.constant -0.284496725 : f32
    %138 = vector.broadcast %cst_128 : f32 to vector<16x64xf32>
    %139 = arith.addf %137, %138 : vector<16x64xf32>
    %140 = arith.mulf %139, %129 : vector<16x64xf32>
    %cst_129 = arith.constant 0.254829586 : f32
    %141 = vector.broadcast %cst_129 : f32 to vector<16x64xf32>
    %142 = arith.addf %140, %141 : vector<16x64xf32>
    %143 = arith.mulf %142, %129 : vector<16x64xf32>
    %cst_130 = arith.constant 0.000000e+00 : f32
    %144 = vector.broadcast %cst_130 : f32 to vector<16x64xf32>
    %145 = arith.subf %144, %123 : vector<16x64xf32>
    %146 = arith.mulf %145, %123 : vector<16x64xf32>
    %147 = math.exp %146 : vector<16x64xf32>
    %148 = arith.mulf %143, %147 : vector<16x64xf32>
    %cst_131 = arith.constant 1.000000e+00 : f32
    %149 = vector.broadcast %cst_131 : f32 to vector<16x64xf32>
    %150 = arith.subf %149, %148 : vector<16x64xf32>
    %cst_132 = arith.constant 0.000000e+00 : f32
    %151 = vector.broadcast %cst_132 : f32 to vector<16x64xf32>
    %152 = arith.cmpf olt, %122, %151 : vector<16x64xf32>
    %cst_133 = arith.constant 0.000000e+00 : f32
    %153 = vector.broadcast %cst_133 : f32 to vector<16x64xf32>
    %154 = arith.subf %153, %150 : vector<16x64xf32>
    %155 = arith.select %152, %154, %150 : vector<16x64xi1>, vector<16x64xf32>
    %cst_134 = arith.constant 1.000000e+00 : f32
    %156 = vector.broadcast %cst_134 : f32 to vector<16x64xf32>
    %157 = arith.addf %156, %155 : vector<16x64xf32>
    %158 = arith.mulf %120, %157 : vector<16x64xf32>
    %159 = arith.mulf %158, %80 : vector<16x64xf32>
    %c3_135 = arith.constant 3 : index
    %c0_136 = arith.constant 0 : index
    %c0_137 = arith.constant 0 : index
    %160 = vector.load %arg2[%c3_135, %c0_136, %c0_137] : memref<5x64x64xf32, #tpu.memory_space<vmem>>, vector<1x64x64xf32>
    %161 = vector.shape_cast %160 : vector<1x64x64xf32> to vector<64x64xf32>
    %cst_138 = arith.constant dense<0.000000e+00> : vector<16x64xf32>
    %162 = tpu.matmul %159, %161, %cst_138 {dimension_numbers = #tpu.dot_dimension_numbers<[1], [0], [0], [1], [0, 0, 1, 1], [], []>} : vector<16x64xf32>, vector<64x64xf32>, vector<16x64xf32> -> vector<16x64xf32>
    %c3_139 = arith.constant 3 : index
    %c0_140 = arith.constant 0 : index
    %c0_141 = arith.constant 0 : index
    %163 = vector.load %arg3[%c3_139, %c0_140, %c0_141] : memref<5x1x64xf32, #tpu.memory_space<vmem>>, vector<1x1x64xf32>
    %164 = vector.shape_cast %163 : vector<1x1x64xf32> to vector<1x64xf32>
    %165 = vector.broadcast %164 : vector<1x64xf32> to vector<16x64xf32>
    %166 = arith.addf %162, %165 : vector<16x64xf32>
    %c2_142 = arith.constant 2 : index
    %c0_143 = arith.constant 0 : index
    %167 = vector.load %arg9[%c2_142, %c0_143] : memref<20x64xf32, #tpu.memory_space<vmem>>, vector<16x64xf32>
    tpu.vector_store %arg9[%c2_142, %c0_143], %166 {strides = array<i32>} : memref<20x64xf32, #tpu.memory_space<vmem>>, vector<16x64xf32>,
    %cst_144 = arith.constant 0.000000e+00 : f32
    %168 = vector.broadcast %cst_144 : f32 to vector<16x64xf32>
    %c0_145 = arith.constant 0 : index
    %c0_146 = arith.constant 0 : index
    %169 = vector.load %arg9[%c0_145, %c0_146] : memref<20x64xf32, #tpu.memory_space<vmem>>, vector<16x64xf32>
    %c15 = arith.constant 15 : index
    %c0_147 = arith.constant 0 : index
    %c0_148 = arith.constant 0 : index
    %170 = vector.load %arg4[%c15, %c0_147, %c0_148] : memref<25x64x64xf32, #tpu.memory_space<vmem>>, vector<1x64x64xf32>
    %171 = vector.shape_cast %170 : vector<1x64x64xf32> to vector<64x64xf32>
    %cst_149 = arith.constant dense<0.000000e+00> : vector<16x64xf32>
    %172 = tpu.matmul %169, %171, %cst_149 {dimension_numbers = #tpu.dot_dimension_numbers<[1], [0], [0], [1], [0, 0, 1, 1], [], []>} : vector<16x64xf32>, vector<64x64xf32>, vector<16x64xf32> -> vector<16x64xf32>
    %173 = arith.addf %168, %172 : vector<16x64xf32>
    %c1_150 = arith.constant 1 : index
    %c0_151 = arith.constant 0 : index
    %174 = vector.load %arg9[%c1_150, %c0_151] : memref<20x64xf32, #tpu.memory_space<vmem>>, vector<16x64xf32>
    %c16 = arith.constant 16 : index
    %c0_152 = arith.constant 0 : index
    %c0_153 = arith.constant 0 : index
    %175 = vector.load %arg4[%c16, %c0_152, %c0_153] : memref<25x64x64xf32, #tpu.memory_space<vmem>>, vector<1x64x64xf32>
    %176 = vector.shape_cast %175 : vector<1x64x64xf32> to vector<64x64xf32>
    %cst_154 = arith.constant dense<0.000000e+00> : vector<16x64xf32>
    %177 = tpu.matmul %174, %176, %cst_154 {dimension_numbers = #tpu.dot_dimension_numbers<[1], [0], [0], [1], [0, 0, 1, 1], [], []>} : vector<16x64xf32>, vector<64x64xf32>, vector<16x64xf32> -> vector<16x64xf32>
    %178 = arith.addf %173, %177 : vector<16x64xf32>
    %c2_155 = arith.constant 2 : index
    %c0_156 = arith.constant 0 : index
    %179 = vector.load %arg9[%c2_155, %c0_156] : memref<20x64xf32, #tpu.memory_space<vmem>>, vector<16x64xf32>
    %c17 = arith.constant 17 : index
    %c0_157 = arith.constant 0 : index
    %c0_158 = arith.constant 0 : index
    %180 = vector.load %arg4[%c17, %c0_157, %c0_158] : memref<25x64x64xf32, #tpu.memory_space<vmem>>, vector<1x64x64xf32>
    %181 = vector.shape_cast %180 : vector<1x64x64xf32> to vector<64x64xf32>
    %cst_159 = arith.constant dense<0.000000e+00> : vector<16x64xf32>
    %182 = tpu.matmul %179, %181, %cst_159 {dimension_numbers = #tpu.dot_dimension_numbers<[1], [0], [0], [1], [0, 0, 1, 1], [], []>} : vector<16x64xf32>, vector<64x64xf32>, vector<16x64xf32> -> vector<16x64xf32>
    %183 = arith.addf %178, %182 : vector<16x64xf32>
    %c3_160 = arith.constant 3 : index
    %c0_161 = arith.constant 0 : index
    %184 = vector.load %arg9[%c3_160, %c0_161] : memref<20x64xf32, #tpu.memory_space<vmem>>, vector<16x64xf32>
    %c18_162 = arith.constant 18 : index
    %c0_163 = arith.constant 0 : index
    %c0_164 = arith.constant 0 : index
    %185 = vector.load %arg4[%c18_162, %c0_163, %c0_164] : memref<25x64x64xf32, #tpu.memory_space<vmem>>, vector<1x64x64xf32>
    %186 = vector.shape_cast %185 : vector<1x64x64xf32> to vector<64x64xf32>
    %cst_165 = arith.constant dense<0.000000e+00> : vector<16x64xf32>
    %187 = tpu.matmul %184, %186, %cst_165 {dimension_numbers = #tpu.dot_dimension_numbers<[1], [0], [0], [1], [0, 0, 1, 1], [], []>} : vector<16x64xf32>, vector<64x64xf32>, vector<16x64xf32> -> vector<16x64xf32>
    %188 = arith.addf %183, %187 : vector<16x64xf32>
    %c4_166 = arith.constant 4 : index
    %c0_167 = arith.constant 0 : index
    %189 = vector.load %arg9[%c4_166, %c0_167] : memref<20x64xf32, #tpu.memory_space<vmem>>, vector<16x64xf32>
    %c19 = arith.constant 19 : index
    %c0_168 = arith.constant 0 : index
    %c0_169 = arith.constant 0 : index
    %190 = vector.load %arg4[%c19, %c0_168, %c0_169] : memref<25x64x64xf32, #tpu.memory_space<vmem>>, vector<1x64x64xf32>
    %191 = vector.shape_cast %190 : vector<1x64x64xf32> to vector<64x64xf32>
    %cst_170 = arith.constant dense<0.000000e+00> : vector<16x64xf32>
    %192 = tpu.matmul %189, %191, %cst_170 {dimension_numbers = #tpu.dot_dimension_numbers<[1], [0], [0], [1], [0, 0, 1, 1], [], []>} : vector<16x64xf32>, vector<64x64xf32>, vector<16x64xf32> -> vector<16x64xf32>
    %193 = arith.addf %188, %192 : vector<16x64xf32>
    %c3_171 = arith.constant 3 : index
    %c0_172 = arith.constant 0 : index
    %c0_173 = arith.constant 0 : index
    %194 = vector.load %arg5[%c3_171, %c0_172, %c0_173] : memref<5x1x64xf32, #tpu.memory_space<vmem>>, vector<1x1x64xf32>
    %195 = vector.shape_cast %194 : vector<1x1x64xf32> to vector<1x64xf32>
    %196 = vector.broadcast %195 : vector<1x64xf32> to vector<16x64xf32>
    %197 = arith.addf %193, %196 : vector<16x64xf32>
    %198 = arith.addf %80, %197 : vector<16x64xf32>
    %cst_174 = arith.constant 5.000000e-01 : f32
    %199 = vector.broadcast %cst_174 : f32 to vector<16x64xf32>
    %200 = arith.mulf %199, %118 : vector<16x64xf32>
    %cst_175 = arith.constant 0.707106769 : f32
    %201 = vector.broadcast %cst_175 : f32 to vector<16x64xf32>
    %202 = arith.mulf %118, %201 : vector<16x64xf32>
    %203 = math.absf %202 : vector<16x64xf32>
    %cst_176 = arith.constant 0.327591091 : f32
    %204 = vector.broadcast %cst_176 : f32 to vector<16x64xf32>
    %205 = arith.mulf %204, %203 : vector<16x64xf32>
    %cst_177 = arith.constant 1.000000e+00 : f32
    %206 = vector.broadcast %cst_177 : f32 to vector<16x64xf32>
    %207 = arith.addf %206, %205 : vector<16x64xf32>
    %cst_178 = arith.constant 1.000000e+00 : f32
    %208 = vector.broadcast %cst_178 : f32 to vector<16x64xf32>
    %209 = arith.divf %208, %207 : vector<16x64xf32>
    %cst_179 = arith.constant 1.06140542 : f32
    %210 = vector.broadcast %cst_179 : f32 to vector<16x64xf32>
    %211 = arith.mulf %210, %209 : vector<16x64xf32>
    %cst_180 = arith.constant -1.45315206 : f32
    %212 = vector.broadcast %cst_180 : f32 to vector<16x64xf32>
    %213 = arith.addf %211, %212 : vector<16x64xf32>
    %214 = arith.mulf %213, %209 : vector<16x64xf32>
    %cst_181 = arith.constant 1.42141378 : f32
    %215 = vector.broadcast %cst_181 : f32 to vector<16x64xf32>
    %216 = arith.addf %214, %215 : vector<16x64xf32>
    %217 = arith.mulf %216, %209 : vector<16x64xf32>
    %cst_182 = arith.constant -0.284496725 : f32
    %218 = vector.broadcast %cst_182 : f32 to vector<16x64xf32>
    %219 = arith.addf %217, %218 : vector<16x64xf32>
    %220 = arith.mulf %219, %209 : vector<16x64xf32>
    %cst_183 = arith.constant 0.254829586 : f32
    %221 = vector.broadcast %cst_183 : f32 to vector<16x64xf32>
    %222 = arith.addf %220, %221 : vector<16x64xf32>
    %223 = arith.mulf %222, %209 : vector<16x64xf32>
    %cst_184 = arith.constant 0.000000e+00 : f32
    %224 = vector.broadcast %cst_184 : f32 to vector<16x64xf32>
    %225 = arith.subf %224, %203 : vector<16x64xf32>
    %226 = arith.mulf %225, %203 : vector<16x64xf32>
    %227 = math.exp %226 : vector<16x64xf32>
    %228 = arith.mulf %223, %227 : vector<16x64xf32>
    %cst_185 = arith.constant 1.000000e+00 : f32
    %229 = vector.broadcast %cst_185 : f32 to vector<16x64xf32>
    %230 = arith.subf %229, %228 : vector<16x64xf32>
    %cst_186 = arith.constant 0.000000e+00 : f32
    %231 = vector.broadcast %cst_186 : f32 to vector<16x64xf32>
    %232 = arith.cmpf olt, %202, %231 : vector<16x64xf32>
    %cst_187 = arith.constant 0.000000e+00 : f32
    %233 = vector.broadcast %cst_187 : f32 to vector<16x64xf32>
    %234 = arith.subf %233, %230 : vector<16x64xf32>
    %235 = arith.select %232, %234, %230 : vector<16x64xi1>, vector<16x64xf32>
    %cst_188 = arith.constant 1.000000e+00 : f32
    %236 = vector.broadcast %cst_188 : f32 to vector<16x64xf32>
    %237 = arith.addf %236, %235 : vector<16x64xf32>
    %238 = arith.mulf %200, %237 : vector<16x64xf32>
    %239 = arith.mulf %238, %80 : vector<16x64xf32>
    %c4_189 = arith.constant 4 : index
    %c0_190 = arith.constant 0 : index
    %c0_191 = arith.constant 0 : index
    %240 = vector.load %arg2[%c4_189, %c0_190, %c0_191] : memref<5x64x64xf32, #tpu.memory_space<vmem>>, vector<1x64x64xf32>
    %241 = vector.shape_cast %240 : vector<1x64x64xf32> to vector<64x64xf32>
    %cst_192 = arith.constant dense<0.000000e+00> : vector<16x64xf32>
    %242 = tpu.matmul %239, %241, %cst_192 {dimension_numbers = #tpu.dot_dimension_numbers<[1], [0], [0], [1], [0, 0, 1, 1], [], []>} : vector<16x64xf32>, vector<64x64xf32>, vector<16x64xf32> -> vector<16x64xf32>
    %c4_193 = arith.constant 4 : index
    %c0_194 = arith.constant 0 : index
    %c0_195 = arith.constant 0 : index
    %243 = vector.load %arg3[%c4_193, %c0_194, %c0_195] : memref<5x1x64xf32, #tpu.memory_space<vmem>>, vector<1x1x64xf32>
    %244 = vector.shape_cast %243 : vector<1x1x64xf32> to vector<1x64xf32>
    %245 = vector.broadcast %244 : vector<1x64xf32> to vector<16x64xf32>
    %246 = arith.addf %242, %245 : vector<16x64xf32>
    %c2_196 = arith.constant 2 : index
    %c0_197 = arith.constant 0 : index
    %247 = vector.load %arg9[%c2_196, %c0_197] : memref<20x64xf32, #tpu.memory_space<vmem>>, vector<16x64xf32>
    tpu.vector_store %arg9[%c2_196, %c0_197], %246 {strides = array<i32>} : memref<20x64xf32, #tpu.memory_space<vmem>>, vector<16x64xf32>,
    %cst_198 = arith.constant 0.000000e+00 : f32
    %248 = vector.broadcast %cst_198 : f32 to vector<16x64xf32>
    %c0_199 = arith.constant 0 : index
    %c0_200 = arith.constant 0 : index
    %249 = vector.load %arg9[%c0_199, %c0_200] : memref<20x64xf32, #tpu.memory_space<vmem>>, vector<16x64xf32>
    %c20 = arith.constant 20 : index
    %c0_201 = arith.constant 0 : index
    %c0_202 = arith.constant 0 : index
    %250 = vector.load %arg4[%c20, %c0_201, %c0_202] : memref<25x64x64xf32, #tpu.memory_space<vmem>>, vector<1x64x64xf32>
    %251 = vector.shape_cast %250 : vector<1x64x64xf32> to vector<64x64xf32>
    %cst_203 = arith.constant dense<0.000000e+00> : vector<16x64xf32>
    %252 = tpu.matmul %249, %251, %cst_203 {dimension_numbers = #tpu.dot_dimension_numbers<[1], [0], [0], [1], [0, 0, 1, 1], [], []>} : vector<16x64xf32>, vector<64x64xf32>, vector<16x64xf32> -> vector<16x64xf32>
    %253 = arith.addf %248, %252 : vector<16x64xf32>
    %c1_204 = arith.constant 1 : index
    %c0_205 = arith.constant 0 : index
    %254 = vector.load %arg9[%c1_204, %c0_205] : memref<20x64xf32, #tpu.memory_space<vmem>>, vector<16x64xf32>
    %c21 = arith.constant 21 : index
    %c0_206 = arith.constant 0 : index
    %c0_207 = arith.constant 0 : index
    %255 = vector.load %arg4[%c21, %c0_206, %c0_207] : memref<25x64x64xf32, #tpu.memory_space<vmem>>, vector<1x64x64xf32>
    %256 = vector.shape_cast %255 : vector<1x64x64xf32> to vector<64x64xf32>
    %cst_208 = arith.constant dense<0.000000e+00> : vector<16x64xf32>
    %257 = tpu.matmul %254, %256, %cst_208 {dimension_numbers = #tpu.dot_dimension_numbers<[1], [0], [0], [1], [0, 0, 1, 1], [], []>} : vector<16x64xf32>, vector<64x64xf32>, vector<16x64xf32> -> vector<16x64xf32>
    %258 = arith.addf %253, %257 : vector<16x64xf32>
    %c2_209 = arith.constant 2 : index
    %c0_210 = arith.constant 0 : index
    %259 = vector.load %arg9[%c2_209, %c0_210] : memref<20x64xf32, #tpu.memory_space<vmem>>, vector<16x64xf32>
    %c22 = arith.constant 22 : index
    %c0_211 = arith.constant 0 : index
    %c0_212 = arith.constant 0 : index
    %260 = vector.load %arg4[%c22, %c0_211, %c0_212] : memref<25x64x64xf32, #tpu.memory_space<vmem>>, vector<1x64x64xf32>
    %261 = vector.shape_cast %260 : vector<1x64x64xf32> to vector<64x64xf32>
    %cst_213 = arith.constant dense<0.000000e+00> : vector<16x64xf32>
    %262 = tpu.matmul %259, %261, %cst_213 {dimension_numbers = #tpu.dot_dimension_numbers<[1], [0], [0], [1], [0, 0, 1, 1], [], []>} : vector<16x64xf32>, vector<64x64xf32>, vector<16x64xf32> -> vector<16x64xf32>
    %263 = arith.addf %258, %262 : vector<16x64xf32>
    %c3_214 = arith.constant 3 : index
    %c0_215 = arith.constant 0 : index
    %264 = vector.load %arg9[%c3_214, %c0_215] : memref<20x64xf32, #tpu.memory_space<vmem>>, vector<16x64xf32>
    %c23 = arith.constant 23 : index
    %c0_216 = arith.constant 0 : index
    %c0_217 = arith.constant 0 : index
    %265 = vector.load %arg4[%c23, %c0_216, %c0_217] : memref<25x64x64xf32, #tpu.memory_space<vmem>>, vector<1x64x64xf32>
    %266 = vector.shape_cast %265 : vector<1x64x64xf32> to vector<64x64xf32>
    %cst_218 = arith.constant dense<0.000000e+00> : vector<16x64xf32>
    %267 = tpu.matmul %264, %266, %cst_218 {dimension_numbers = #tpu.dot_dimension_numbers<[1], [0], [0], [1], [0, 0, 1, 1], [], []>} : vector<16x64xf32>, vector<64x64xf32>, vector<16x64xf32> -> vector<16x64xf32>
    %268 = arith.addf %263, %267 : vector<16x64xf32>
    %c4_219 = arith.constant 4 : index
    %c0_220 = arith.constant 0 : index
    %269 = vector.load %arg9[%c4_219, %c0_220] : memref<20x64xf32, #tpu.memory_space<vmem>>, vector<16x64xf32>
    %c24 = arith.constant 24 : index
    %c0_221 = arith.constant 0 : index
    %c0_222 = arith.constant 0 : index
    %270 = vector.load %arg4[%c24, %c0_221, %c0_222] : memref<25x64x64xf32, #tpu.memory_space<vmem>>, vector<1x64x64xf32>
    %271 = vector.shape_cast %270 : vector<1x64x64xf32> to vector<64x64xf32>
    %cst_223 = arith.constant dense<0.000000e+00> : vector<16x64xf32>
    %272 = tpu.matmul %269, %271, %cst_223 {dimension_numbers = #tpu.dot_dimension_numbers<[1], [0], [0], [1], [0, 0, 1, 1], [], []>} : vector<16x64xf32>, vector<64x64xf32>, vector<16x64xf32> -> vector<16x64xf32>
    %273 = arith.addf %268, %272 : vector<16x64xf32>
    %c4_224 = arith.constant 4 : index
    %c0_225 = arith.constant 0 : index
    %c0_226 = arith.constant 0 : index
    %274 = vector.load %arg5[%c4_224, %c0_225, %c0_226] : memref<5x1x64xf32, #tpu.memory_space<vmem>>, vector<1x1x64xf32>
    %275 = vector.shape_cast %274 : vector<1x1x64xf32> to vector<1x64xf32>
    %276 = vector.broadcast %275 : vector<1x64xf32> to vector<16x64xf32>
    %277 = arith.addf %273, %276 : vector<16x64xf32>
    %278 = arith.addf %80, %277 : vector<16x64xf32>
    %279 = tpu.concatenate %198, %278 in 1 : vector<16x64xf32>, vector<16x64xf32> -> vector<16x128xf32>
    %c0_227 = arith.constant 0 : index
    %c0_228 = arith.constant 0 : index
    %280 = vector.load %arg6[%c0_227, %c0_228] : memref<128x64xf32, #tpu.memory_space<vmem>>, vector<128x64xf32>
    %cst_229 = arith.constant dense<0.000000e+00> : vector<16x64xf32>
    %281 = tpu.matmul %279, %280, %cst_229 {dimension_numbers = #tpu.dot_dimension_numbers<[1], [0], [0], [1], [0, 0, 1, 1], [], []>} : vector<16x128xf32>, vector<128x64xf32>, vector<16x64xf32> -> vector<16x64xf32>
    %c0_230 = arith.constant 0 : index
    %c0_231 = arith.constant 0 : index
    %282 = vector.load %arg7[%c0_230, %c0_231] : memref<1x64xf32, #tpu.memory_space<vmem>>, vector<1x64xf32>
    %283 = vector.broadcast %282 : vector<1x64xf32> to vector<16x64xf32>
    %284 = arith.addf %281, %283 : vector<16x64xf32>
    %c0_232 = arith.constant 0 : index
    %c0_233 = arith.constant 0 : index
    %285 = vector.load %arg8[%c0_232, %c0_233] : memref<16x64xf32, #tpu.memory_space<vmem>>, vector<16x64xf32>
    tpu.vector_store %arg8[%c0_232, %c0_233], %284 {strides = array<i32>} : memref<16x64xf32, #tpu.memory_space<vmem>>, vector<16x64xf32>,
    return
  }
  func.func @transform_0(%arg0: i32) -> (i32, i32) {
    %c0_i32 = arith.constant 0 : i32
    %c0_i32_0 = arith.constant 0 : i32
    return %arg0, %c0_i32 : i32, i32
  }
  func.func @transform_1(%arg0: i32) -> (i32, i32, i32) {
    %c0_i32 = arith.constant 0 : i32
    %c0_i32_0 = arith.constant 0 : i32
    %c0_i32_1 = arith.constant 0 : i32
    %c0_i32_2 = arith.constant 0 : i32
    return %c0_i32, %c0_i32_0, %c0_i32_1 : i32, i32, i32
  }
  func.func @transform_2(%arg0: i32) -> (i32, i32, i32) {
    %c0_i32 = arith.constant 0 : i32
    %c0_i32_0 = arith.constant 0 : i32
    %c0_i32_1 = arith.constant 0 : i32
    %c0_i32_2 = arith.constant 0 : i32
    return %c0_i32, %c0_i32_0, %c0_i32_1 : i32, i32, i32
  }
  func.func @transform_3(%arg0: i32) -> (i32, i32, i32) {
    %c0_i32 = arith.constant 0 : i32
    %c0_i32_0 = arith.constant 0 : i32
    %c0_i32_1 = arith.constant 0 : i32
    %c0_i32_2 = arith.constant 0 : i32
    return %c0_i32, %c0_i32_0, %c0_i32_1 : i32, i32, i32
  }
  func.func @transform_4(%arg0: i32) -> (i32, i32, i32) {
    %c0_i32 = arith.constant 0 : i32
    %c0_i32_0 = arith.constant 0 : i32
    %c0_i32_1 = arith.constant 0 : i32
    %c0_i32_2 = arith.constant 0 : i32
    return %c0_i32, %c0_i32_0, %c0_i32_1 : i32, i32, i32
  }
  func.func @transform_5(%arg0: i32) -> (i32, i32) {
    %c0_i32 = arith.constant 0 : i32
    %c0_i32_0 = arith.constant 0 : i32
    %c0_i32_1 = arith.constant 0 : i32
    return %c0_i32, %c0_i32_0 : i32, i32
  }
  func.func @transform_6(%arg0: i32) -> (i32, i32) {
    %c0_i32 = arith.constant 0 : i32
    %c0_i32_0 = arith.constant 0 : i32
    %c0_i32_1 = arith.constant 0 : i32
    return %c0_i32, %c0_i32_0 : i32, i32
  }
  func.func @transform_7(%arg0: i32) -> (i32, i32) {
    %c0_i32 = arith.constant 0 : i32
    %c0_i32_0 = arith.constant 0 : i32
    return %arg0, %c0_i32 : i32, i32
  }
}

</mosaic_0001>

<bundles_post_ra>
// kernel: tpu_custom_call.1
= control target key start
LH: loop header
LB: loop body
LE: loop exit
PB: predicated region body
PF: predicated region fallthrough
CT: control target
= control target key end

     0   :  { %12 = vsyncpa [#allocation4], 0  ;;  %s2635_s0 = inlined_call_operand.vmem [shape: f32[32,64], index: 0, kind: input, shape index: {}]   ;;  %s2636_s1 = inlined_call_operand.hbm [shape: f32[5,64,64], index: 1, kind: input, shape index: {}]   ;;  %s2637_s2 = inlined_call_operand.vmem [shape: f32[5,1,64], index: 2, kind: input, shape index: {}]   ;;  %s2638_s3 = inlined_call_operand.hbm [shape: f32[25,64,64], index: 3, kind: input, shape index: {}]   ;;  %s2639_s4 = inlined_call_operand.vmem [shape: f32[5,1,64], index: 4, kind: input, shape index: {}]   ;;  %s2640_s5 = inlined_call_operand.vmem [shape: f32[128,64], index: 5, kind: input, shape index: {}]   ;;  %s2641_s6 = inlined_call_operand.vmem [shape: f32[1,64], index: 6, kind: input, shape index: {}]   ;;  %s2642_s7 = inlined_call_operand.hbm [shape: f32[32,64], index: 7, kind: output, shape index: {}]  }
   0x1   :  { %13 = vsyncpa [#allocation7], 0 }
   0x2   :  { %14 = vsyncpa [#allocation5], 0 }
   0x3   :  { %16 = vsyncpa [#allocation5 + $0x1], 0  ;;  %s2275_s24 = smov 0   ;;  %s2277_s25 = smov 0  }
   0x4   :  { %s2279_s26 = smov 0   ;;  %s2281_s27 = smov 0  }
   0x5 LB: > { %s2296_s28 = sadd.s32 4294967295, %s2225_s27   ;;  %s1917_s29 = sadd.s32 4294967294, %s2225_s27   ;;  %s2225_s27 = sphi %s2281_s27, %s2649_s27   ;;  %s2221_s26 = sphi %s2279_s26, %s2648_s26   ;;  %s2217_s25 = sphi %s2277_s25, %s2647_s25   ;;  %s2213_s24 = sphi %s2275_s24, %s2646_s24  }
   0x6   : > { %s2300_s30 = sadd.s32 1, %s2225_s27   ;;  %s181_s8 = sadd.s32 1, %s2221_s26 }
   0x7   : > { %s178_s9 = ssub.s32 %s2225_s27, %s2300_s30  ;;  %p191_p0 = scmp.ne.s32.totalorder %s2221_s26, %s2217_s25 }
   0x8   : > { %p179_p1 = scmp.eq.s32.totalorder %s178_s9, 0  ;;  %p192_p2 = scmp.eq.s32.totalorder %s2296_s28, 1 }
   0x9   : > { %p197_p3 = scmp.ne.s32.totalorder %s2217_s25, %s2213_s24  ;;  %p198_p4 = scmp.eq.s32.totalorder %s1917_s29, 1 }
   0xa   : > { %s2311_s10 = scalar_select %p179_p1, %s2221_s26, %s181_s8  }
   0xb   : > { %p2313_p5 = por %p192_p2, %p191_p0  ;;  %p2317_p6 = por %p198_p4, %p197_p3 }
   0xc   : > { %p1918_p7 = scmp.ge.s32.totalorder %s2225_s27, 1  ;;  %p205_p8 = scmp.lt.s32.totalorder %s2225_s27, 3 }
   0xd   : > { %p2023_p9 = scmp.eq.s32.totalorder %s2296_s28, 0  ;;  %s216_s16 = sshll.u32 %s2636_s1, 4  ;;  %s217_s16 = int_to_ptr.hbm [resolvable:$true] %s216_s16 }
   0xe   : > { %p2324_p10 = pnand %p1918_p7, %p205_p8  ;;  %s2227_s17 = smov [#allocation3]  }
   0xf   : > { %s218_s18 = sshll.u32 %s2227_s17, 4  ;;  %s233_s21 = sshll.u32 %s2638_s3, 4  ;;  %s219_s18 = int_to_ptr.vmem [resolvable:$true] %s218_s18  ;;  %s234_s21 = int_to_ptr.hbm [resolvable:$true] %s233_s21 }
  0x10   : > { %p2012_p11 = pneg %p2324_p10  ;;  %s2228_s22 = smov 128  }
  0x11   : > { %s2229_s23 = smov 8   ;;  %s2230_s29 = smov [#allocation6]  }
  0x12   : > { %p2013_p12 = pnand %p2023_p9, %p2012_p11  ;;  %s235_s8 = sshll.u32 %s2230_s29, 4  ;;  %s236_s8 = int_to_ptr.vmem [resolvable:$true] %s235_s8 }
  0x13   : > { %269 = sbr.rel (%p2324_p10) target bundleno = 1105 (0x451), region = 48 }
  0x14   : > { %2015 = dma.hbm_to_vmem [thread:$0]  (!%p2013_p12), %s217_s16, 5120, %s219_s18, [#allocation4], %s2228_s22, %s2228_s22, %s2229_s23  }
  0x15   : > { %2018 = dma.hbm_to_vmem [thread:$0]  (!%p2013_p12), %s234_s21, 25600, %s236_s8, [#allocation7], %s2228_s22, %s2228_s22, %s2229_s23  }
  0x18   : > { %2200 = dma.done.wait (%p2023_p9), [#allocation4], 5120  }
  0x19   : > { %2202 = vsyncadd (%p2023_p9), [#allocation4], 4294962176 }
  0x1a   : > { %2204 = dma.done.wait (%p2023_p9), [#allocation7], 25600  }
  0x1b   : > { %2206 = vsyncadd (%p2023_p9), [#allocation7], 4294941696  ;;  %s1926_s9 = sshll.u32 %s2296_s28, 1  ;;  %v326_v0 = vld [vmem:[#allocation3 + $0x38] sm:$0xff]  ;;  %v325_v1 = vld [vmem:[#allocation3 + $0x30] sm:$0xff]  ;;  %vm331_vm0 = vcmask 523264  }
  0x1c   : > { %p308_p13 = scmp.lt.s32.totalorder %s1926_s9, 3  ;;  %346 = vmatpush.msra.mxu0 %v326_v0  ;;  %v324_v2 = vld [vmem:[#allocation3 + $0x28] sm:$0xff]  ;;  %v582_v3 = vld [vmem:[#allocation3 + $0x78] sm:$0xff]  ;;  %v581_v4 = vld [vmem:[#allocation3 + $0x70] sm:$0xff]  ;;  %vm314_vm1 = vcmask 517120   ;;  %v2231_v29 = vmov 0.0  }
  0x1d   : > { %596 = vmatpush.msra.mxu2 %v582_v3  ;;  %v323_v5 = vld [vmem:[#allocation3 + $0x20] sm:$0xff]  ;;  %v580_v6 = vld [vmem:[#allocation3 + $0x68] sm:$0xff]  ;;  %v322_v7 = vld [vmem:[#allocation3 + $0x18] sm:$0xff]  ;;  %315 = vst.msk [vmem:[#allocation2] sm:$0x3] %vm314_vm1, %v2231_v29  ;;  %s2232_s19 = smov 64  }
  0x1e   : > { %347 = vmatpush.msra.mxu0 %v325_v1  ;;  %s2651_s9 = smov (!%p308_p13, %s1926_s9), 3  ;;  %v579_v8 = vld [vmem:[#allocation3 + $0x60] sm:$0xff]  ;;  %v321_v9 = vld [vmem:[#allocation3 + $0x10] sm:$0xff]  ;;  %v578_v10 = vld [vmem:[#allocation3 + $0x58] sm:$0xff]  ;;  %316 = vst.msk [vmem:[#allocation2 + $0x12] sm:$0x3] %vm314_vm1, %v2231_v29 }
  0x1f   : > { %597 = vmatpush.msra.mxu2 %v581_v4  ;;  %v383_v11 = vld [vmem:[#allocation6 + $0x78] sm:$0xff]  ;;  %s1927_s13 = sshll.u32 %s2651_s9, 3  ;;  %v382_v13 = vld [vmem:[#allocation6 + $0x70] sm:$0xff]  ;;  %v320_v15 = vld [vmem:[#allocation3 + $0x8] sm:$0xff]  ;;  %s304_s14 = sand.u32 1, %s2217_s25  }
  0x20   : > { %348 = vmatpush.msra.mxu0 %v324_v2  ;;  %v372_v12 = vld [vmem:[#allocation6 + $0x38] sm:$0xff]  ;;  %v371_v14 = vld [vmem:[#allocation6 + $0x30] sm:$0xff]  ;;  %398 = vmatpush.msra.mxu1 %v383_v11  ;;  %s311_s16 = scalar_lea.vmem %s2635_s0, %s1927_s13  ;;  %v319_v17 = vld [vmem:[#allocation3] sm:$0xff]  ;;  %s1925_s15 = sshll.u32 %s304_s14, 4 }
  0x21   : > { %598 = vmatpush.msra.mxu2 %v580_v6  ;;  %v577_v16 = vld [vmem:[#allocation3 + $0x50] sm:$0xff]  ;;  %427 = vmatpush.msra.mxu3 %v372_v12  ;;  %v576_v18 = vld [vmem:[#allocation3 + $0x48] sm:$0xff]  ;;  %v575_v20 = vld [vmem:[#allocation3 + $0x40] sm:$0xff]  ;;  %s2001_s18 = sshll.u32 %s2296_s28, 4  ;;  %s1818_s8 = scalar_lea.sflag [#allocation5], %s304_s14 }
  0x22   : > { %349 = vmatpush.msra.mxu0 %v323_v5  ;;  %399 = vmatpush.msra.mxu1 %v382_v13  ;;  %v2352_v19 = vld [vmem:[%s311_s16] sm:$0xff]  ;;  %v2358_v21 = vld [vmem:[%s311_s16 + $0x8] sm:$0xff]  ;;  %v380_v24 = vld [vmem:[#allocation6 + $0x60] sm:$0xff]  ;;  %s1829_s22 = scalar_lea.hbm %s2642_s7, %s2001_s18  ;;  %s2175_s16 = scalar_lea.hbm %s2642_s7, 32 }
  0x23   : > { %599 = vmatpush.msra.mxu2 %v579_v8  ;;  %428 = vmatpush.msra.mxu3 %v371_v14  ;;  %v381_v22 = vld [vmem:[#allocation6 + $0x68] sm:$0xff]  ;;  %v369_v25 = vld [vmem:[#allocation6 + $0x20] sm:$0xff]  ;;  %v494_v26 = vld [vmem:[#allocation6 + $0xf8] sm:$0xff]  ;;  %s1832_s29 = sshll.u32 %s1829_s22, 4  ;;  %s1833_s29 = int_to_ptr.hbm [resolvable:$true] %s1832_s29 }
  0x24   : > { %350 = vmatpush.msra.mxu0 %v322_v7  ;;  %v370_v23 = vld [vmem:[#allocation6 + $0x28] sm:$0xff]  ;;  %400 = vmatpush.msra.mxu1 %v381_v22  ;;  %v379_v27 = vld [vmem:[#allocation6 + $0x58] sm:$0xff]  ;;  %v493_v30 = vld [vmem:[#allocation6 + $0xf0] sm:$0xff]  ;;  %s2169_s9 = sshra.s32 %s1833_s29, 4  ;;  %s2170_s9 = int_to_ptr.hbm [resolvable:$true] %s2169_s9 }
  0x25   : > { %600 = vmatpush.msra.mxu2 %v578_v10  ;;  %429 = vmatpush.msra.mxu3 %v370_v23  ;;  %v368_v28 = vld [vmem:[#allocation6 + $0x18] sm:$0xff]  ;;  %v378_v31 = vld [vmem:[#allocation6 + $0x50] sm:$0xff]  ;;  %v492_v33 = vld [vmem:[#allocation6 + $0xe8] sm:$0xff]  ;;  %s2171_s28 = scalar_lea.hbm %s2170_s9, 16  ;;  %p2176_p3 = scmp.lt.s32.totalorder %s2170_s9, %s2642_s7 }
  0x26   : > { %351 = vmatpush.msra.mxu0 %v321_v9  ;;  %401 = vmatpush.msra.mxu1 %v380_v24  ;;  %v367_v32 = vld [vmem:[#allocation6 + $0x10] sm:$0xff]  ;;  %v377_v34 = vld [vmem:[#allocation6 + $0x48] sm:$0xff]  ;;  %v491_v36 = vld [vmem:[#allocation6 + $0xe0] sm:$0xff]  ;;  %p2172_p0 = scmp.ne.s32.totalorder %s2170_s9, %s2171_s28  ;;  %p2177_p4 = scmp.lt.s32.totalorder %s2175_s16, %s2171_s28 }
  0x27   : > { %601 = vmatpush.msra.mxu2 %v577_v16  ;;  %430 = vmatpush.msra.mxu3 %v369_v25  ;;  %v366_v35 = vld [vmem:[#allocation6 + $0x8] sm:$0xff]  ;;  %v376_v37 = vld [vmem:[#allocation6 + $0x40] sm:$0xff]  ;;  %v490_v39 = vld [vmem:[#allocation6 + $0xd8] sm:$0xff] }
  0x28   : > { %352 = vmatpush.msra.mxu0 %v320_v15  ;;  %402 = vmatpush.msra.mxu1 %v379_v27  ;;  %v365_v38 = vld [vmem:[#allocation6] sm:$0xff]  ;;  %v452_v40 = vld [vmem:[#allocation6 + $0xb8] sm:$0xff]  ;;  %v489_v42 = vld [vmem:[#allocation6 + $0xd0] sm:$0xff]  ;;  %p2173_p1 = pnand %p2172_p0, %p2313_p5  ;;  %p2178_p7 = por %p2177_p4, %p2176_p3 }
  0x29   : > { %602 = vmatpush.msra.mxu2 %v576_v18  ;;  %431 = vmatpush.msra.mxu3 %v368_v28  ;;  %v536_v41 = vld [vmem:[#allocation6 + $0x138] sm:$0xff]  ;;  %v451_v43 = vld [vmem:[#allocation6 + $0xb0] sm:$0xff]  ;;  %v488_v45 = vld [vmem:[#allocation6 + $0xc8] sm:$0xff] }
  0x2a   : > { %353 = vmatpush.msra.mxu0 %v319_v17  ;;  %403 = vmatpush.msra.mxu1 %v378_v31  ;;  %v535_v44 = vld [vmem:[#allocation6 + $0x130] sm:$0xff]  ;;  %v450_v46 = vld [vmem:[#allocation6 + $0xa8] sm:$0xff]  ;;  %v487_v48 = vld [vmem:[#allocation6 + $0xc0] sm:$0xff]  ;;  %p2174_p2 = pneg %p2173_p1 }
  0x2b   : > { %1928 = vmatmul.msk.f32.vlgmr.msra.gmra.mxu0 %vm331_vm0, %v2352_v19  ;;  %603 = vmatpush.msra.mxu2 %v575_v20  ;;  %v534_v47 = vld [vmem:[#allocation6 + $0x128] sm:$0xff]  ;;  %v449_v49 = vld [vmem:[#allocation6 + $0xa0] sm:$0xff]  ;;  %v623_v51 = vld [vmem:[#allocation6 + $0x178] sm:$0xff] }
  0x2c   : > { %1941 = vmatmul.msk.f32.vlgmr.msra.gmra.mxu2 %vm331_vm0, %v2352_v19  ;;  %509 = vmatpush.msrb.mxu0 %v494_v26  ;;  %v533_v50 = vld [vmem:[#allocation6 + $0x120] sm:$0xff]  ;;  %v448_v52 = vld [vmem:[#allocation6 + $0x98] sm:$0xff]  ;;  %v622_v55 = vld [vmem:[#allocation6 + $0x170] sm:$0xff]  ;;  %p2179_p8 = pnand %p2178_p7, %p2174_p2 }
  0x2d   : > { %432 = vmatpush.msra.mxu3 %v367_v32  ;;  %404 = vmatpush.msra.mxu1 %v377_v34  ;;  %v532_v53 = vld [vmem:[#allocation6 + $0x118] sm:$0xff]  ;;  %v447_v56 = vld [vmem:[#allocation6 + $0x90] sm:$0xff]  ;;  %v621_v59 = vld [vmem:[#allocation6 + $0x168] sm:$0xff] }
  0x2e   : > { %510 = vmatpush.msrb.mxu0 %v493_v30  ;;  %v745_v54 = vld [vmem:[#allocation6 + $0x238] sm:$0xff]  ;;  %v531_v57 = vld [vmem:[#allocation6 + $0x110] sm:$0xff]  ;;  %v446_v60 = vld [vmem:[#allocation6 + $0x88] sm:$0xff] }
  0x2f   : > { %433 = vmatpush.msra.mxu3 %v366_v35  ;;  %405 = vmatpush.msra.mxu1 %v376_v37  ;;  %v744_v58 = vld [vmem:[#allocation6 + $0x230] sm:$0xff]  ;;  %v530_v61 = vld [vmem:[#allocation6 + $0x108] sm:$0xff]  ;;  %v620_v63 = vld [vmem:[#allocation6 + $0x160] sm:$0xff] }
  0x30   : > { %511 = vmatpush.msrb.mxu0 %v492_v33  ;;  %760 = vmatpush.msrb.mxu2 %v745_v54  ;;  %v743_v62 = vld [vmem:[#allocation6 + $0x228] sm:$0xff]  ;;  %v445_v0 = vld [vmem:[#allocation6 + $0x80] sm:$0xff]  ;;  %v619_v3 = vld [vmem:[#allocation6 + $0x158] sm:$0xff] }
  0x31   : > { %434 = vmatpush.msra.mxu3 %v365_v38  ;;  %551 = vmatpush.msrb.mxu1 %v536_v41  ;;  %v529_v1 = vld [vmem:[#allocation6 + $0x100] sm:$0xff]  ;;  %v2068_v4 = vld [vmem:[%s2637_s2] ss:$0 sm:$0xff]  ;;  %v741_v5 = vld [vmem:[#allocation6 + $0x218] sm:$0xff] }
  0x32   : > { %512 = vmatpush.msrb.mxu0 %v491_v36  ;;  %761 = vmatpush.msrb.mxu2 %v744_v58  ;;  %v742_v2 = vld [vmem:[#allocation6 + $0x220] sm:$0xff]  ;;  %v618_v6 = vld [vmem:[#allocation6 + $0x150] sm:$0xff]  ;;  %v617_v8 = vld [vmem:[#allocation6 + $0x148] sm:$0xff] }
  0x33   : > { %1929 = vmatmul.msk.f32.gmra.mxu0 %vm331_vm0, %v2358_v21  ;;  %467 = vmatpush.msrb.mxu3 %v452_v40  ;;  %v740_v7 = vld [vmem:[#allocation6 + $0x210] sm:$0xff]  ;;  %v739_v9 = vld [vmem:[#allocation6 + $0x208] sm:$0xff]  ;;  %v616_v11 = vld [vmem:[#allocation6 + $0x140] sm:$0xff] }
  0x34   : > { %1942 = vmatmul.msk.f32.gmra.mxu2 %vm331_vm0, %v2358_v21  ;;  %513 = vmatpush.msrb.mxu0 %v490_v39  ;;  %v738_v13 = vld [vmem:[#allocation6 + $0x200] sm:$0xff]  ;;  %v634_v17 = vld [vmem:[#allocation6 + $0x1b8] sm:$0xff]  ;;  %v633_v23 = vld [vmem:[#allocation6 + $0x1b0] sm:$0xff] }
  0x35   : > { %468 = vmatpush.msrb.mxu3 %v451_v43  ;;  %552 = vmatpush.msrb.mxu1 %v535_v44  ;;  %v703_v18 = vld [vmem:[#allocation6 + $0x1f8] sm:$0xff]  ;;  %v702_v24 = vld [vmem:[#allocation6 + $0x1f0] sm:$0xff]  ;;  %v2069_v25 = vld [vmem:[%s2637_s2 + $0x1] ss:$0 sm:$0xff] }
  0x36   : > { %514 = vmatpush.msrb.mxu0 %v489_v42  ;;  %762 = vmatpush.msrb.mxu2 %v743_v62  ;;  %v632_v26 = vld [vmem:[#allocation6 + $0x1a8] sm:$0xff]  ;;  %v631_v28 = vld [vmem:[#allocation6 + $0x1a0] sm:$0xff]  ;;  %v834_v32 = vld [vmem:[#allocation3 + $0xb8] sm:$0xff] }
  0x37   : > { %469 = vmatpush.msrb.mxu3 %v450_v46  ;;  %553 = vmatpush.msrb.mxu1 %v534_v47  ;;  %v701_v27 = vld [vmem:[#allocation6 + $0x1e8] sm:$0xff]  ;;  %v700_v29 = vld [vmem:[#allocation6 + $0x1e0] sm:$0xff]  ;;  %v630_v34 = vld [vmem:[#allocation6 + $0x198] sm:$0xff] }
  0x38   : > { %515 = vmatpush.msrb.mxu0 %v488_v45  ;;  %763 = vmatpush.msrb.mxu2 %v742_v2  ;;  %v699_v35 = vld [vmem:[#allocation6 + $0x1d8] sm:$0xff]  ;;  %v629_v36 = vld [vmem:[#allocation6 + $0x190] sm:$0xff]  ;;  %v628_v47 = vld [vmem:[#allocation6 + $0x188] sm:$0xff] }
  0x39   : > { %470 = vmatpush.msrb.mxu3 %v449_v49  ;;  %554 = vmatpush.msrb.mxu1 %v533_v50  ;;  %v833_v40 = vld [vmem:[#allocation3 + $0xb0] sm:$0xff]  ;;  %v697_v49 = vld [vmem:[#allocation6 + $0x1c8] sm:$0xff]  ;;  %v627_v50 = vld [vmem:[#allocation6 + $0x180] sm:$0xff] }
  0x3a   : > { %516 = vmatpush.msrb.mxu0 %v487_v48  ;;  %764 = vmatpush.msrb.mxu2 %v741_v5  ;;  %v698_v43 = vld [vmem:[#allocation6 + $0x1d0] sm:$0xff]  ;;  %v832_v48 = vld [vmem:[#allocation3 + $0xa8] sm:$0xff] }
  0x3b   : > { %471 = vmatpush.msrb.mxu3 %v448_v52  ;;  %555 = vmatpush.msrb.mxu1 %v532_v53  ;;  %v831_v52 = vld [vmem:[#allocation3 + $0xa0] sm:$0xff]  ;;  %v787_v53 = vld [vmem:[#allocation6 + $0x278] sm:$0xff]  ;;  %v785_v58 = vld [vmem:[#allocation6 + $0x268] sm:$0xff] }
  0x3c   : > { %678 = vmatpush.msra.mxu0 %v623_v51  ;;  %765 = vmatpush.msrb.mxu2 %v740_v7  ;;  %v696_v51 = vld [vmem:[#allocation6 + $0x1c0] sm:$0xff]  ;;  %v828_v62 = vld [vmem:[#allocation3 + $0x88] sm:$0xff] }
  0x3d   : > { %472 = vmatpush.msrb.mxu3 %v447_v56  ;;  %556 = vmatpush.msrb.mxu1 %v531_v57  ;;  %v786_v56 = vld [vmem:[#allocation6 + $0x270] sm:$0xff]  ;;  %v781_v2 = vld [vmem:[#allocation6 + $0x248] sm:$0xff] }
  0x3e   : > { %679 = vmatpush.msra.mxu0 %v622_v55  ;;  %766 = vmatpush.msrb.mxu2 %v739_v9  ;;  %v830_v55 = vld [vmem:[#allocation3 + $0x98] sm:$0xff]  ;;  %v829_v57 = vld [vmem:[#allocation3 + $0x90] sm:$0xff] }
  0x3f   : > { %473 = vmatpush.msrb.mxu3 %v446_v60  ;;  %557 = vmatpush.msrb.mxu1 %v530_v61  ;;  %v784_v60 = vld [vmem:[#allocation6 + $0x260] sm:$0xff] }
  0x40   : > { %680 = vmatpush.msra.mxu0 %v621_v59  ;;  %767 = vmatpush.msrb.mxu2 %v738_v13  ;;  %v875_v13 = vld [vmem:[#allocation6 + $0x2b8] sm:$0xff] }
  0x41   : > { %474 = vmatpush.msrb.mxu3 %v445_v0  ;;  %558 = vmatpush.msrb.mxu1 %v529_v1  ;;  %v827_v0 = vld [vmem:[#allocation3 + $0x80] sm:$0xff]  ;;  %v782_v1 = vld [vmem:[#allocation6 + $0x250] sm:$0xff] }
  0x42   : > { %681 = vmatpush.msra.mxu0 %v620_v63  ;;  %v783_v63 = vld [vmem:[#allocation6 + $0x258] sm:$0xff]  ;;  %930 = vmatpush.msra.mxu2 %v875_v13 }
  0x44   : > { %682 = vmatpush.msra.mxu0 %v619_v3  ;;  %v780_v3 = vld [vmem:[#allocation6 + $0x240] sm:$0xff] }
  0x46   : > { %683 = vmatpush.msra.mxu0 %v618_v6 }
  0x48   : > { %684 = vmatpush.msra.mxu0 %v617_v8 }
  0x4a   : > { %685 = vmatpush.msra.mxu0 %v616_v11 }
  0xa8   : > { %v355_v10 = vpop.f32.mrf.mxu0 }
  0xa9   : > { %v356_v12 = vadd.f32 %v2068_v4, %v355_v10 }
  0xab   : > { %361 = vst.msk [vmem:[#allocation2 + $0x2] sm:$0xff] %vm331_vm0, %v356_v12  ;;  %v886_v12 = vld [vmem:[#allocation6 + $0x2f8] sm:$0xff] }
  0xaf   : > { %v605_v15 = vpop.f32.mrf.mxu2 }
  0xb0   : > { %v358_v14 = vpop.f32.mrf.mxu0  ;;  %v606_v30 = vadd.f32 %v2069_v25, %v605_v15 }
  0xb1   : > { %v359_v16 = vadd.f32 %v2068_v4, %v358_v14  ;;  %v955_v14 = vld [vmem:[#allocation6 + $0x338] sm:$0xff] }
  0xb2   : > { %v373_v20 = vld [vmem:[#allocation2 + $0x1] sm:$0xff] }
  0xb3   : > { %v363_v22 = vld [vmem:[#allocation2] sm:$0xff]  ;;  %362 = vst.msk [vmem:[#allocation2 + $0xa] sm:$0xff] %vm331_vm0, %v359_v16  ;;  %1930 = vmatmul.msk.f32.vlgmr.msra.gmra.mxu1 %vm331_vm0, %v373_v20  ;;  %v885_v16 = vld [vmem:[#allocation6 + $0x2f0] sm:$0xff] }
  0xb4   : > { %1932 = vmatmul.msk.f32.vlgmr.msra.gmra.mxu3 %vm331_vm0, %v363_v22  ;;  %718 = vmatpush.msra.mxu1 %v703_v18  ;;  %v442_v41 = vld [vmem:[#allocation2 + $0x2] sm:$0xff] }
  0xb5   : > { %649 = vmatpush.msra.mxu3 %v634_v17  ;;  %v874_v17 = vld [vmem:[#allocation6 + $0x2b0] sm:$0xff]  ;;  %v884_v20 = vld [vmem:[#allocation6 + $0x2e8] sm:$0xff] }
  0xb6   : > { %719 = vmatpush.msra.mxu1 %v702_v24  ;;  %931 = vmatpush.msra.mxu2 %v874_v17  ;;  %v953_v22 = vld [vmem:[#allocation6 + $0x328] sm:$0xff]  ;;  %v872_v24 = vld [vmem:[#allocation6 + $0x2a0] sm:$0xff]  ;;  %v1168_v17 = vld [vmem:[#allocation3 + $0xf8] sm:$0xff] }
  0xb7   : > { %650 = vmatpush.msra.mxu3 %v633_v23  ;;  %v608_v31 = vpop.f32.mrf.mxu2  ;;  %v883_v23 = vld [vmem:[#allocation6 + $0x2e0] sm:$0xff] }
  0xb8   : > { %720 = vmatpush.msra.mxu1 %v701_v27  ;;  %v609_v33 = vadd.f32 %v2069_v25, %v608_v31  ;;  %v952_v25 = vld [vmem:[#allocation6 + $0x320] sm:$0xff]  ;;  %v871_v27 = vld [vmem:[#allocation6 + $0x298] sm:$0xff] }
  0xb9   : > { %651 = vmatpush.msra.mxu3 %v632_v26  ;;  %v882_v26 = vld [vmem:[#allocation6 + $0x2d8] sm:$0xff] }
  0xba   : > { %v374_v37 = vld [vmem:[#allocation2 + $0x9] sm:$0xff]  ;;  %721 = vmatpush.msra.mxu1 %v700_v29 }
  0xbb   : > { %v364_v38 = vld [vmem:[#allocation2 + $0x8] sm:$0xff]  ;;  %652 = vmatpush.msra.mxu3 %v631_v28  ;;  %1931 = vmatmul.msk.f32.gmra.mxu1 %vm331_vm0, %v374_v37  ;;  %v951_v28 = vld [vmem:[#allocation6 + $0x318] sm:$0xff]  ;;  %v880_v37 = vld [vmem:[#allocation6 + $0x2c8] sm:$0xff] }
  0xbc   : > { %v484_v39 = vld [vmem:[#allocation2 + $0x3] sm:$0xff]  ;;  %1933 = vmatmul.msk.f32.gmra.mxu3 %vm331_vm0, %v364_v38  ;;  %v485_v44 = vld [vmem:[#allocation2 + $0xb] sm:$0xff]  ;;  %722 = vmatpush.msra.mxu1 %v699_v35 }
  0xbd   : > { %v526_v42 = vld [vmem:[#allocation2 + $0x4] sm:$0xff]  ;;  %1936 = vmatmul.msk.f32.vlgmr.msrb.gmra.mxu0 %vm331_vm0, %v484_v39  ;;  %v527_v46 = vld [vmem:[#allocation2 + $0xc] sm:$0xff]  ;;  %653 = vmatpush.msra.mxu3 %v630_v34 }
  0xbe   : > { %611 = vst.msk [vmem:[#allocation2 + $0x2] sm:$0xff] %vm331_vm0, %v606_v30  ;;  %v443_v45 = vld [vmem:[#allocation2 + $0xa] sm:$0xff]  ;;  %848 = vmatpush.msrb.mxu0 %v834_v32  ;;  %723 = vmatpush.msra.mxu1 %v698_v43  ;;  %v869_v38 = vld [vmem:[#allocation6 + $0x288] sm:$0xff]  ;;  %v948_v43 = vld [vmem:[#allocation6 + $0x300] sm:$0xff] }
  0xbf   : > { %612 = vst.msk [vmem:[#allocation2 + $0xa] sm:$0xff] %vm331_vm0, %v609_v33  ;;  %654 = vmatpush.msra.mxu3 %v629_v36  ;;  %v997_v31 = vld [vmem:[#allocation6 + $0x378] sm:$0xff]  ;;  %v881_v32 = vld [vmem:[#allocation6 + $0x2d0] sm:$0xff]  ;;  %v949_v39 = vld [vmem:[#allocation6 + $0x308] sm:$0xff] }
  0xc0   : > { %849 = vmatpush.msrb.mxu0 %v833_v40  ;;  %724 = vmatpush.msra.mxu1 %v697_v49  ;;  %v870_v33 = vld [vmem:[#allocation6 + $0x290] sm:$0xff]  ;;  %v995_v40 = vld [vmem:[#allocation6 + $0x368] sm:$0xff] }
  0xc1   : > { %655 = vmatpush.msra.mxu3 %v628_v47  ;;  %v950_v34 = vld [vmem:[#allocation6 + $0x310] sm:$0xff]  ;;  %v993_v47 = vld [vmem:[#allocation6 + $0x358] sm:$0xff] }
  0xc2   : > { %850 = vmatpush.msrb.mxu0 %v832_v48  ;;  %725 = vmatpush.msra.mxu1 %v696_v51  ;;  %v996_v35 = vld [vmem:[#allocation6 + $0x370] sm:$0xff] }
  0xc3   : > { %656 = vmatpush.msra.mxu3 %v627_v50  ;;  %1938 = vmatmul.msk.f32.vlgmr.msrb.gmra.mxu1 %vm331_vm0, %v526_v42  ;;  %v868_v42 = vld [vmem:[#allocation6 + $0x280] sm:$0xff]  ;;  %v1038_v50 = vld [vmem:[#allocation6 + $0x3b0] sm:$0xff] }
  0xc4   : > { %1934 = vmatmul.msk.f32.vlgmr.msrb.gmra.mxu3 %vm331_vm0, %v442_v41  ;;  %851 = vmatpush.msrb.mxu0 %v831_v52  ;;  %v879_v41 = vld [vmem:[#allocation6 + $0x2c0] sm:$0xff]  ;;  %v992_v51 = vld [vmem:[#allocation6 + $0x350] sm:$0xff] }
  0xc5   : > { %1937 = vmatmul.msk.f32.gmra.mxu0 %vm331_vm0, %v485_v44  ;;  %802 = vmatpush.msrb.mxu3 %v787_v53  ;;  %v613_v59 = vld [vmem:[#allocation2] sm:$0xff]  ;;  %v994_v44 = vld [vmem:[#allocation6 + $0x360] sm:$0xff] }
  0xc6   : > { %v735_v54 = vld [vmem:[#allocation2 + $0x3] sm:$0xff]  ;;  %852 = vmatpush.msrb.mxu0 %v830_v55  ;;  %v736_v61 = vld [vmem:[#allocation2 + $0xb] sm:$0xff]  ;;  %901 = vmatpush.msrb.mxu1 %v886_v12 }
  0xc7   : > { %1949 = vmatmul.msk.f32.vlgmr.msrb.gmra.mxu2 %vm331_vm0, %v735_v54  ;;  %803 = vmatpush.msrb.mxu3 %v786_v56  ;;  %v624_v4 = vld [vmem:[#allocation2 + $0x1] sm:$0xff]  ;;  %v625_v7 = vld [vmem:[#allocation2 + $0x9] sm:$0xff]  ;;  %v2070_v54 = vld [vmem:[%s2639_s4] ss:$0 sm:$0xff] }
  0xc8   : > { %853 = vmatpush.msrb.mxu0 %v829_v57  ;;  %v693_v5 = vld [vmem:[#allocation2 + $0x2] sm:$0xff]  ;;  %v694_v8 = vld [vmem:[#allocation2 + $0xa] sm:$0xff]  ;;  %902 = vmatpush.msrb.mxu1 %v885_v16 }
  0xc9   : > { %804 = vmatpush.msrb.mxu3 %v785_v58  ;;  %v614_v6 = vld [vmem:[#allocation2 + $0x8] sm:$0xff]  ;;  %v1037_v56 = vld [vmem:[#allocation6 + $0x3a8] sm:$0xff] }
  0xca   : > { %854 = vmatpush.msrb.mxu0 %v828_v62  ;;  %v777_v9 = vld [vmem:[#allocation2 + $0x4] sm:$0xff]  ;;  %v778_v10 = vld [vmem:[#allocation2 + $0xc] sm:$0xff]  ;;  %903 = vmatpush.msrb.mxu1 %v884_v20 }
  0xcb   : > { %1939 = vmatmul.msk.f32.gmra.mxu1 %vm331_vm0, %v527_v46  ;;  %805 = vmatpush.msrb.mxu3 %v784_v60  ;;  %v1039_v46 = vld [vmem:[#allocation6 + $0x3b8] sm:$0xff]  ;;  %v991_v57 = vld [vmem:[#allocation6 + $0x348] sm:$0xff]  ;;  %v990_v60 = vld [vmem:[#allocation6 + $0x340] sm:$0xff] }
  0xcc   : > { %1935 = vmatmul.msk.f32.gmra.mxu3 %vm331_vm0, %v443_v45  ;;  %855 = vmatpush.msrb.mxu0 %v827_v0  ;;  %v1167_v20 = vld [vmem:[#allocation3 + $0xf0] sm:$0xff] }
  0xcd   : > { %1945 = vmatmul.msk.f32.vlgmr.msra.gmra.mxu0 %vm331_vm0, %v613_v59  ;;  %806 = vmatpush.msrb.mxu3 %v783_v63  ;;  %v1036_v59 = vld [vmem:[#allocation6 + $0x3a0] sm:$0xff]  ;;  %v1035_v63 = vld [vmem:[#allocation6 + $0x398] sm:$0xff] }
  0xce   : > { %904 = vmatpush.msrb.mxu1 %v883_v23  ;;  %1012 = vmatpush.msra.mxu0 %v997_v31 }
  0xcf   : > { %1950 = vmatmul.msk.f32.gmra.mxu2 %vm331_vm0, %v736_v61  ;;  %807 = vmatpush.msrb.mxu3 %v782_v1 }
  0xd0   : > { %905 = vmatpush.msrb.mxu1 %v882_v26  ;;  %1013 = vmatpush.msra.mxu0 %v996_v35 }
  0xd1   : > { %808 = vmatpush.msrb.mxu3 %v781_v2 }
  0xd2   : > { %906 = vmatpush.msrb.mxu1 %v881_v32  ;;  %1014 = vmatpush.msra.mxu0 %v995_v40  ;;  %v1162_v40 = vld [vmem:[#allocation3 + $0xc8] sm:$0xff] }
  0xd3   : > { %1947 = vmatmul.msk.f32.vlgmr.msra.gmra.mxu1 %vm331_vm0, %v693_v5  ;;  %809 = vmatpush.msrb.mxu3 %v780_v3  ;;  %v1034_v3 = vld [vmem:[#allocation6 + $0x390] sm:$0xff] }
  0xd4   : > { %1943 = vmatmul.msk.f32.vlgmr.msra.gmra.mxu3 %vm331_vm0, %v624_v4  ;;  %907 = vmatpush.msrb.mxu1 %v880_v37 }
  0xd5   : > { %1946 = vmatmul.msk.f32.gmra.mxu0 %vm331_vm0, %v614_v6  ;;  %970 = vmatpush.msra.mxu3 %v955_v14  ;;  %v2071_v14 = vld [vmem:[%s2637_s2 + $0x2] ss:$0 sm:$0xff] }
  0xd6   : > { %908 = vmatpush.msrb.mxu1 %v879_v41  ;;  %1015 = vmatpush.msra.mxu0 %v994_v44 }
  0xd8   : > { %1054 = vmatpush.msra.mxu1 %v1039_v46  ;;  %1016 = vmatpush.msra.mxu0 %v993_v47 }
  0xda   : > { %1055 = vmatpush.msra.mxu1 %v1038_v50  ;;  %1017 = vmatpush.msra.mxu0 %v992_v51 }
  0xdb   : > { %1948 = vmatmul.msk.f32.gmra.mxu1 %vm331_vm0, %v694_v8 }
  0xdc   : > { %1944 = vmatmul.msk.f32.gmra.mxu3 %vm331_vm0, %v625_v7  ;;  %1056 = vmatpush.msra.mxu1 %v1037_v56  ;;  %v1033_v7 = vld [vmem:[#allocation6 + $0x388] sm:$0xff] }
  0xdd   : > { %1955 = vmatmul.msk.f32.vlgmr.msrb.gmra.mxu0 %vm331_vm0, %v2352_v19  ;;  %v954_v19 = vld [vmem:[#allocation6 + $0x330] sm:$0xff] }
  0xde   : > { %971 = vmatpush.msra.mxu3 %v954_v19  ;;  %1018 = vmatpush.msra.mxu0 %v991_v57 }
  0xdf   : > { %1057 = vmatpush.msra.mxu1 %v1036_v59 }
  0xe0   : > { %972 = vmatpush.msra.mxu3 %v953_v22  ;;  %1019 = vmatpush.msra.mxu0 %v990_v60 }
  0xe1   : > { %1058 = vmatpush.msra.mxu1 %v1035_v63 }
  0xe2   : > { %973 = vmatpush.msra.mxu3 %v952_v25  ;;  %v1166_v25 = vld [vmem:[#allocation3 + $0xe8] sm:$0xff] }
  0xe3   : > { %1059 = vmatpush.msra.mxu1 %v1034_v3 }
  0xe4   : > { %1951 = vmatmul.msk.f32.vlgmr.msrb.gmra.mxu3 %vm331_vm0, %v777_v9 }
  0xe5   : > { %1956 = vmatmul.msk.f32.gmra.mxu0 %vm331_vm0, %v2358_v21  ;;  %v873_v21 = vld [vmem:[#allocation6 + $0x2a8] sm:$0xff]  ;;  %974 = vmatpush.msra.mxu3 %v951_v28 }
  0xe6   : > { %932 = vmatpush.msra.mxu2 %v873_v21  ;;  %1060 = vmatpush.msra.mxu1 %v1033_v7 }
  0xe7   : > { %975 = vmatpush.msra.mxu3 %v950_v34 }
  0xe8   : > { %933 = vmatpush.msra.mxu2 %v872_v24 }
  0xe9   : > { %976 = vmatpush.msra.mxu3 %v949_v39 }
  0xea   : > { %934 = vmatpush.msra.mxu2 %v871_v27  ;;  %v1165_v27 = vld [vmem:[#allocation3 + $0xe0] sm:$0xff] }
  0xeb   : > { %977 = vmatpush.msra.mxu3 %v948_v43  ;;  %v1161_v43 = vld [vmem:[#allocation3 + $0xc0] sm:$0xff] }
  0xec   : > { %1952 = vmatmul.msk.f32.gmra.mxu3 %vm331_vm0, %v778_v10  ;;  %935 = vmatpush.msra.mxu2 %v870_v33  ;;  %v1164_v33 = vld [vmem:[#allocation3 + $0xd8] sm:$0xff] }
  0xee   : > { %936 = vmatpush.msra.mxu2 %v869_v38  ;;  %v1163_v38 = vld [vmem:[#allocation3 + $0xd0] sm:$0xff] }
  0xf0   : > { %937 = vmatpush.msra.mxu2 %v868_v42 }
  0xf2   : > { %1188 = vmatpush.msrb.mxu2 %v1168_v17 }
  0xf4   : > { %1189 = vmatpush.msrb.mxu2 %v1167_v20 }
  0xf6   : > { %1190 = vmatpush.msrb.mxu2 %v1166_v25 }
  0xf8   : > { %1191 = vmatpush.msrb.mxu2 %v1165_v27 }
  0xfa   : > { %1192 = vmatpush.msrb.mxu2 %v1164_v33 }
  0xfc   : > { %1193 = vmatpush.msrb.mxu2 %v1163_v38  ;;  %v2072_v38 = vld [vmem:[%s2639_s4 + $0x1] ss:$0 sm:$0xff] }
  0xfe   : > { %1194 = vmatpush.msrb.mxu2 %v1162_v40 }
 0x100   : > { %1195 = vmatpush.msrb.mxu2 %v1161_v43 }
 0x130   : > { %v407_v11 = vpop.f32.mrf.mxu1 }
 0x137   : > { %v436_v15 = vpop.f32.mrf.mxu3 }
 0x138   : > { %v410_v29 = vpop.f32.mrf.mxu1  ;;  %v437_v45 = vadd.f32 %v436_v15, %v407_v11  ;;  %v1032_v11 = vld [vmem:[#allocation6 + $0x380] sm:$0xff] }
 0x139   : > { %1061 = vmatpush.msra.mxu1 %v1032_v11 }
 0x13a   : > { %v518_v18 = vpop.f32.mrf.mxu0 }
 0x13f   : > { %v439_v30 = vpop.f32.mrf.mxu3 }
 0x140   : > { %v560_v52 = vpop.f32.mrf.mxu1  ;;  %v440_v61 = vadd.f32 %v439_v30, %v410_v29 }
 0x142   : > { %v521_v36 = vpop.f32.mrf.mxu0 }
 0x147   : > { %v476_v48 = vpop.f32.mrf.mxu3 }
 0x148   : > { %v482_v49 = vadd.f32 %v476_v48, %v437_v45  ;;  %v563_v8 = vpop.f32.mrf.mxu1 }
 0x14a   : > { %v524_v53 = vadd.f32 %v518_v18, %v482_v49  ;;  %v2401_v55 = vpop.f32.mrf.mxu0 }
 0x14c   : > { %v566_v58 = vadd.f32 %v560_v52, %v524_v53 }
 0x14e   : > { %v2403_v62 = vadd.f32 %v2070_v54, %v566_v58 }
 0x14f   : > { %v479_v0 = vpop.f32.mrf.mxu3 }
 0x150   : > { %v2406_v1 = vmul.f32 0.70710677, %v2403_v62  ;;  %v483_v2 = vadd.f32 %v479_v0, %v440_v61 }
 0x152   : > { %v2409_v4 = vand.u32 2147483647, %v2406_v1  ;;  %v525_v5 = vadd.f32 %v521_v36, %v483_v2  ;;  %v2411_v6 = vpop.f32.mrf.mxu0  ;;  %vm1148_vm10 = vcmp.lt.f32.partialorder %v2406_v1, 0.0 }
 0x154   : > { %v1084_v9 = vmul.f32 0.3275911, %v2409_v4  ;;  %v567_v10 = vadd.f32 %v563_v8, %v525_v5  ;;  %v1136_v45 = vsub.f32 0.0, %v2409_v4 }
 0x156   : > { %v1086_v12 = vadd.f32 1.0, %v1084_v9  ;;  %v2414_v13 = vadd.f32 %v2070_v54, %v567_v10  ;;  %v1138_v52 = vmul.f32 %v1136_v45, %v2409_v4 }
 0x157   : > { %v658_v47 = vpop.f32.mrf.mxu3 }
 0x158   : > { %2079 = vrcp.f32 %v1086_v12  ;;  %v2420_v15 = vmul.f32 0.70710677, %v2414_v13  ;;  %v1099_v28 = vand.u32 2147483648, %v1086_v12  ;;  %v1097_v31 = vand.u32 2147483647, %v1086_v12 }
 0x159   : > { %vm1093_vm3 = vweird.f32 %v1086_v12  ;;  %v1140_v2 = vmul.f32 1.442695, %v1138_v52 }
 0x15a   : > { %v857_v16 = vpop.f32.mrf.mxu0  ;;  %v2423_v19 = vand.u32 2147483647, %v2420_v15  ;;  %v1100_v39 = vor.u32 1.1754944e-38, %v1099_v28  ;;  %vm1098_vm5 = vcmp.eq.f32.partialorder %v1097_v31, 8.507059e+37  ;;  %vm1149_vm11 = vcmp.lt.f32.partialorder %v2420_v15, 0.0  ;;  %v1214_v15 = vld [vmem:[#allocation6 + $0x3f0] sm:$0xff] }
 0x15b   : > { %v858_v18 = vadd.f32 %v2071_v14, %v857_v16 }
 0x15c   : > { %v1085_v21 = vmul.f32 0.3275911, %v2423_v19  ;;  %v1137_v5 = vsub.f32 0.0, %v2423_v19 }
 0x15d   : > { %863 = vst.msk [vmem:[#allocation2 + $0x2] sm:$0xff] %vm331_vm0, %v858_v18  ;;  %v688_v18 = vadd.f32 %v2401_v55, %v658_v47 }
 0x15e   : > { %v2080_v22 = vpop.eup %2079  ;;  %v2427_v24 = vadd.f32 1.0, %v1085_v21  ;;  %v1139_v16 = vmul.f32 %v1137_v5, %v2423_v19 }
 0x15f   : > { %v1089_v23 = vmul.f32 %v2080_v22, %v1086_v12  ;;  %vm1094_vm2 = vweird.f32 %v2080_v22  ;;  %v661_v8 = vpop.f32.mrf.mxu3 }
 0x160   : > { %2081 = vrcp.f32 %v2427_v24  ;;  %vm1095_vm4 = vmor %vm1093_vm3, %vm1094_vm2  ;;  %v1114_v51 = vand.u32 2147483648, %v2427_v24  ;;  %v1112_v58 = vand.u32 2147483647, %v2427_v24  ;;  %vm1108_vm7 = vweird.f32 %v2427_v24 }
 0x161   : > { %v1090_v26 = vsub.f32 1.0, %v1089_v23  ;;  %2083 = vpow2.f32 %v1140_v2  ;;  %v1142_v25 = vmul.f32 1.442695, %v1139_v16  ;;  %v1226_v2 = vld [vmem:[#allocation6 + $0x438] sm:$0xff]  ;;  %v1223_v16 = vld [vmem:[#allocation6 + $0x420] sm:$0xff] }
 0x162   : > { %v860_v29 = vpop.f32.mrf.mxu0  ;;  %v1115_v0 = vor.u32 1.1754944e-38, %v1114_v51  ;;  %vm1113_vm9 = vcmp.eq.f32.partialorder %v1112_v58, 8.507059e+37  ;;  %1241 = vmatpush.msrb.mxu3 %v1226_v2  ;;  %v1509_v2 = vld [vmem:[#allocation3 + $0x130] sm:$0xff] }
 0x163   : > { %v1091_v30 = vmul.f32 %v2080_v22, %v1090_v26  ;;  %v861_v32 = vadd.f32 %v2071_v14, %v860_v29  ;;  %2085 = vpow2.f32 %v1142_v25  ;;  %v1211_v25 = vld [vmem:[#allocation6 + $0x3d8] sm:$0xff] }
 0x164   : > { %v876_v34 = vld [vmem:[#allocation2 + $0x1] sm:$0xff] }
 0x165   : > { %v865_v35 = vld [vmem:[#allocation2] sm:$0xff]  ;;  %v1092_v37 = vadd.f32 %v2080_v22, %v1091_v30  ;;  %864 = vst.msk [vmem:[#allocation2 + $0xa] sm:$0xff] %vm331_vm0, %v861_v32  ;;  %1957 = vmatmul.msk.f32.vlgmr.msrb.gmra.mxu1 %vm331_vm0, %v876_v34  ;;  %v769_v30 = vpop.f32.mrf.mxu2 }
 0x166   : > { %v945_v36 = vld [vmem:[#allocation2 + $0x2] sm:$0xff]  ;;  %1959 = vmatmul.msk.f32.vlgmr.msra.gmra.mxu2 %vm331_vm0, %v865_v35  ;;  %v2082_v41 = vpop.eup %2081 }
 0x167   : > { %1961 = vmatmul.msk.f32.vlgmr.msra.gmra.mxu3 %vm331_vm0, %v945_v36  ;;  %v1096_v42 = vsel %vm1095_vm4, %v2080_v22, %v1092_v37  ;;  %v1104_v46 = vmul.f32 %v2082_v41, %v2427_v24  ;;  %vm1109_vm6 = vweird.f32 %v2082_v41  ;;  %v727_v22 = vpop.f32.mrf.mxu1  ;;  %v2084_v26 = vpop.eup %2083  ;;  %v691_v36 = vadd.f32 %v2411_v6, %v661_v8  ;;  %v1294_v8 = vld [vmem:[#allocation6 + $0x470] sm:$0xff] }
 0x168   : > { %v1101_v44 = vsel %vm1098_vm5, %v1100_v39, %v1096_v42  ;;  %vm1110_vm8 = vmor %vm1108_vm7, %vm1109_vm6  ;;  %v733_v27 = vadd.f32 %v727_v22, %v688_v18  ;;  %v811_v31 = vpop.f32.mrf.mxu3  ;;  %v1292_v18 = vld [vmem:[#allocation6 + $0x460] sm:$0xff] }
 0x169   : > { %v1118_v48 = vmul.f32 1.0614054, %v1101_v44  ;;  %v1105_v49 = vsub.f32 1.0, %v1104_v46  ;;  %v2086_v45 = vpop.eup %2085 }
 0x16a   : > { %v775_v55 = vadd.f32 %v769_v30, %v733_v27  ;;  %v1221_v30 = vld [vmem:[#allocation6 + $0x410] sm:$0xff] }
 0x16b   : > { %v1120_v50 = vadd.f32 -1.4531521, %v1118_v48  ;;  %v1106_v57 = vmul.f32 %v2082_v41, %v1105_v49 }
 0x16c   : > { %v877_v53 = vld [vmem:[#allocation2 + $0x9] sm:$0xff]  ;;  %v817_v37 = vadd.f32 %v811_v31, %v775_v55 }
 0x16d   : > { %v866_v54 = vld [vmem:[#allocation2 + $0x8] sm:$0xff]  ;;  %v1122_v59 = vmul.f32 %v1120_v50, %v1101_v44  ;;  %1958 = vmatmul.msk.f32.gmra.mxu1 %vm331_vm0, %v877_v53  ;;  %v1107_v61 = vadd.f32 %v2082_v41, %v1106_v57  ;;  %v772_v49 = vpop.f32.mrf.mxu2 }
 0x16e   : > { %v946_v56 = vld [vmem:[#allocation2 + $0xa] sm:$0xff]  ;;  %1960 = vmatmul.msk.f32.gmra.mxu2 %vm331_vm0, %v866_v54  ;;  %v2456_v48 = vadd.f32 %v2072_v38, %v817_v37  ;;  %v1289_v37 = vld [vmem:[#allocation6 + $0x448] sm:$0xff] }
 0x16f   : > { %v987_v60 = vld [vmem:[#allocation2 + $0x3] sm:$0xff]  ;;  %1962 = vmatmul.msk.f32.gmra.mxu3 %vm331_vm0, %v946_v56  ;;  %v1124_v63 = vadd.f32 1.4214138, %v1122_v59  ;;  %v1111_v3 = vsel %vm1110_vm8, %v2082_v41, %v1107_v61  ;;  %v988_v17 = vld [vmem:[#allocation2 + $0xb] sm:$0xff]  ;;  %v1078_v41 = vmul.f32 0.5, %v2403_v62  ;;  %v730_v43 = vpop.f32.mrf.mxu1  ;;  %v1079_v56 = vmul.f32 0.5, %v2414_v13 }
 0x170   : > { %1963 = vmatmul.msk.f32.vlgmr.msra.gmra.mxu0 %vm331_vm0, %v987_v60  ;;  %v1116_v7 = vsel %vm1113_vm9, %v1115_v0, %v1111_v3  ;;  %v1029_v11 = vld [vmem:[#allocation2 + $0x4] sm:$0xff]  ;;  %v1030_v19 = vld [vmem:[#allocation2 + $0xc] sm:$0xff]  ;;  %v734_v46 = vadd.f32 %v730_v43, %v691_v36  ;;  %v814_v50 = vpop.f32.mrf.mxu3 }
 0x171   : > { %v1126_v4 = vmul.f32 %v1124_v63, %v1101_v44  ;;  %v1119_v9 = vmul.f32 1.0614054, %v1116_v7  ;;  %v1215_v3 = vld [vmem:[#allocation6 + $0x3f8] sm:$0xff]  ;;  %v1225_v13 = vld [vmem:[#allocation6 + $0x430] sm:$0xff]  ;;  %v1209_v36 = vld [vmem:[#allocation6 + $0x3c8] sm:$0xff] }
 0x172   : > { %v776_v52 = vadd.f32 %v772_v49, %v734_v46  ;;  %1270 = vmatpush.msrb.mxu0 %v1215_v3  ;;  %1242 = vmatpush.msrb.mxu3 %v1225_v13  ;;  %v1210_v31 = vld [vmem:[#allocation6 + $0x3d0] sm:$0xff]  ;;  %v1373_v13 = vld [vmem:[#allocation6 + $0x4c8] sm:$0xff] }
 0x173   : > { %v1128_v10 = vadd.f32 -0.28449672, %v1126_v4  ;;  %v1121_v12 = vadd.f32 -1.4531521, %v1119_v9  ;;  %v1295_v4 = vld [vmem:[#allocation6 + $0x478] sm:$0xff]  ;;  %v1374_v3 = vld [vmem:[#allocation6 + $0x4d0] sm:$0xff] }
 0x174   : > { %v818_v54 = vadd.f32 %v814_v50, %v776_v52  ;;  %1310 = vmatpush.msrb.mxu1 %v1295_v4  ;;  %1271 = vmatpush.msrb.mxu0 %v1214_v15  ;;  %v1378_v52 = vld [vmem:[#allocation6 + $0x4f0] sm:$0xff] }
 0x175   : > { %v1130_v14 = vmul.f32 %v1128_v10, %v1101_v44  ;;  %1965 = vmatmul.msk.f32.vlgmr.msra.gmra.mxu1 %vm331_vm0, %v1029_v11  ;;  %v1123_v20 = vmul.f32 %v1121_v12, %v1116_v7  ;;  %v1224_v10 = vld [vmem:[#allocation6 + $0x428] sm:$0xff] }
 0x176   : > { %v2462_v58 = vadd.f32 %v2072_v38, %v818_v54  ;;  %1311 = vmatpush.msrb.mxu1 %v1294_v8  ;;  %v1213_v11 = vld [vmem:[#allocation6 + $0x3e8] sm:$0xff]  ;;  %1243 = vmatpush.msrb.mxu3 %v1224_v10  ;;  %v1372_v10 = vld [vmem:[#allocation6 + $0x4c0] sm:$0xff] }
 0x177   : > { %v1132_v21 = vadd.f32 0.2548296, %v1130_v14  ;;  %v1125_v23 = vadd.f32 1.4214138, %v1123_v20  ;;  %1272 = vmatpush.msrb.mxu0 %v1213_v11  ;;  %v1293_v14 = vld [vmem:[#allocation6 + $0x468] sm:$0xff] }
 0x178   : > { %1964 = vmatmul.msk.f32.gmra.mxu0 %vm331_vm0, %v988_v17  ;;  %1312 = vmatpush.msrb.mxu1 %v1293_v14  ;;  %v1212_v17 = vld [vmem:[#allocation6 + $0x3e0] sm:$0xff]  ;;  %v1335_v38 = vld [vmem:[#allocation6 + $0x4a8] sm:$0xff] }
 0x179   : > { %v1134_v24 = vmul.f32 %v1132_v21, %v1101_v44  ;;  %v1127_v28 = vmul.f32 %v1125_v23, %v1116_v7  ;;  %v2073_v21 = vld [vmem:[%s2639_s4 + $0x2] ss:$0 sm:$0xff]  ;;  %1244 = vmatpush.msrb.mxu3 %v1223_v16  ;;  %1273 = vmatpush.msrb.mxu0 %v1212_v17  ;;  %v1506_v16 = vld [vmem:[#allocation3 + $0x118] sm:$0xff] }
 0x17a   : > { %1313 = vmatpush.msrb.mxu1 %v1292_v18 }
 0x17b   : > { %v1144_v29 = vmul.f32 %v2084_v26, %v1134_v24  ;;  %v1129_v32 = vadd.f32 -0.28449672, %v1127_v28  ;;  %v1222_v24 = vld [vmem:[#allocation6 + $0x418] sm:$0xff]  ;;  %1274 = vmatpush.msrb.mxu0 %v1211_v25  ;;  %v1504_v25 = vld [vmem:[#allocation3 + $0x108] sm:$0xff] }
 0x17c   : > { %v1291_v26 = vld [vmem:[#allocation6 + $0x458] sm:$0xff]  ;;  %1245 = vmatpush.msrb.mxu3 %v1222_v24 }
 0x17d   : > { %v1146_v33 = vsub.f32 1.0, %v1144_v29  ;;  %1966 = vmatmul.msk.f32.gmra.mxu1 %vm331_vm0, %v1030_v19  ;;  %v1131_v34 = vmul.f32 %v1129_v32, %v1116_v7  ;;  %v1337_v28 = vld [vmem:[#allocation6 + $0x4b8] sm:$0xff]  ;;  %v1290_v19 = vld [vmem:[#allocation6 + $0x450] sm:$0xff]  ;;  %1275 = vmatpush.msrb.mxu0 %v1210_v31 }
 0x17e   : > { %1314 = vmatpush.msrb.mxu1 %v1291_v26  ;;  %1352 = vmatpush.msra.mxu2 %v1337_v28  ;;  %v1503_v26 = vld [vmem:[#allocation3 + $0x100] sm:$0xff] }
 0x17f   : > { %v1150_v35 = vsub.f32 0.0, %v1146_v33  ;;  %v1133_v39 = vadd.f32 0.2548296, %v1131_v34  ;;  %1246 = vmatpush.msrb.mxu3 %v1221_v30  ;;  %1276 = vmatpush.msrb.mxu0 %v1209_v36 }
 0x180   : > { %1315 = vmatpush.msrb.mxu1 %v1290_v19 }
 0x181   : > { %v1152_v40 = vsel %vm1148_vm10, %v1150_v35, %v1146_v33  ;;  %v1135_v44 = vmul.f32 %v1133_v39, %v1116_v7  ;;  %v1336_v33 = vld [vmem:[#allocation6 + $0x4b0] sm:$0xff]  ;;  %v1220_v35 = vld [vmem:[#allocation6 + $0x408] sm:$0xff] }
 0x182   : > { %v1154_v42 = vadd.f32 1.0, %v1152_v40  ;;  %1353 = vmatpush.msra.mxu2 %v1336_v33  ;;  %1247 = vmatpush.msrb.mxu3 %v1220_v35  ;;  %v1219_v40 = vld [vmem:[#allocation6 + $0x400] sm:$0xff] }
 0x183   : > { %v1145_v6 = vmul.f32 %v2086_v45, %v1135_v44  ;;  %1316 = vmatpush.msrb.mxu1 %v1289_v37  ;;  %v1334_v44 = vld [vmem:[#allocation6 + $0x4a0] sm:$0xff] }
 0x184   : > { %v1156_v47 = vmul.f32 %v1154_v42, %v1078_v41  ;;  %1354 = vmatpush.msra.mxu2 %v1335_v38  ;;  %v1208_v41 = vld [vmem:[#allocation6 + $0x3c0] sm:$0xff]  ;;  %1248 = vmatpush.msrb.mxu3 %v1219_v40 }
 0x185   : > { %v1147_v51 = vsub.f32 1.0, %v1145_v6  ;;  %v1288_v42 = vld [vmem:[#allocation6 + $0x440] sm:$0xff]  ;;  %1277 = vmatpush.msrb.mxu0 %v1208_v41  ;;  %v1379_v6 = vld [vmem:[#allocation6 + $0x4f8] sm:$0xff] }
 0x186   : > { %v1158_v1 = vmul.f32 %v1156_v47, %v2456_v48  ;;  %1317 = vmatpush.msrb.mxu1 %v1288_v42  ;;  %1355 = vmatpush.msra.mxu2 %v1334_v44  ;;  %v1333_v47 = vld [vmem:[#allocation6 + $0x498] sm:$0xff] }
 0x187   : > { %v1151_v53 = vsub.f32 0.0, %v1147_v51  ;;  %1394 = vmatpush.msra.mxu3 %v1379_v6 }
 0x188   : > { %1969 = vmatmul.msk.f32.vlgmr.msrb.gmra.mxu2 %vm331_vm0, %v1158_v1 }
 0x189   : > { %v1153_v62 = vsel %vm1149_vm11, %v1151_v53, %v1147_v51  ;;  %1356 = vmatpush.msra.mxu2 %v1333_v47  ;;  %v1332_v51 = vld [vmem:[#allocation6 + $0x490] sm:$0xff]  ;;  %1395 = vmatpush.msra.mxu3 %v1378_v52 }
 0x18a   : > { %v1155_v57 = vadd.f32 1.0, %v1153_v62  ;;  %v1331_v62 = vld [vmem:[#allocation6 + $0x488] sm:$0xff] }
 0x18b   : > { %1357 = vmatpush.msra.mxu2 %v1332_v51 }
 0x18c   : > { %v1157_v59 = vmul.f32 %v1155_v57, %v1079_v56  ;;  %v1377_v56 = vld [vmem:[#allocation6 + $0x4e8] sm:$0xff]  ;;  %v1330_v57 = vld [vmem:[#allocation6 + $0x480] sm:$0xff] }
 0x18d   : > { %1396 = vmatpush.msra.mxu3 %v1377_v56  ;;  %1358 = vmatpush.msra.mxu2 %v1331_v62 }
 0x18e   : > { %v1159_v60 = vmul.f32 %v1157_v59, %v2462_v58  ;;  %v1376_v59 = vld [vmem:[#allocation6 + $0x4e0] sm:$0xff] }
 0x18f   : > { %1397 = vmatpush.msra.mxu3 %v1376_v59  ;;  %1359 = vmatpush.msra.mxu2 %v1330_v57 }
 0x190   : > { %1970 = vmatmul.msk.f32.gmra.mxu2 %vm331_vm0, %v1159_v60 }
 0x1e2   : > { %v910_v61 = vpop.f32.mrf.mxu1 }
 0x1e9   : > { %v939_v63 = vpop.f32.mrf.mxu2 }
 0x1ea   : > { %v940_v0 = vadd.f32 %v939_v63, %v910_v61  ;;  %v979_v5 = vpop.f32.mrf.mxu3  ;;  %v913_v7 = vpop.f32.mrf.mxu1  ;;  %v1510_v61 = vld [vmem:[#allocation3 + $0x138] sm:$0xff] }
 0x1eb   : > { %v1375_v63 = vld [vmem:[#allocation6 + $0x4d8] sm:$0xff]  ;;  %1530 = vmatpush.msra.mxu0 %v1510_v61 }
 0x1ec   : > { %v985_v9 = vadd.f32 %v979_v5, %v940_v0  ;;  %1398 = vmatpush.msra.mxu3 %v1375_v63 }
 0x1ed   : > { %v1021_v12 = vpop.f32.mrf.mxu0  ;;  %1531 = vmatpush.msra.mxu0 %v1509_v2 }
 0x1ee   : > { %v1027_v22 = vadd.f32 %v1021_v12, %v985_v9  ;;  %1399 = vmatpush.msra.mxu3 %v1374_v3  ;;  %v1507_v9 = vld [vmem:[#allocation3 + $0x120] sm:$0xff]  ;;  %v2074_v12 = vld [vmem:[%s2637_s2 + $0x3] ss:$0 sm:$0xff] }
 0x1f0   : > { %1400 = vmatpush.msra.mxu3 %v1373_v13 }
 0x1f1   : > { %v942_v20 = vpop.f32.mrf.mxu2 }
 0x1f2   : > { %v943_v23 = vadd.f32 %v942_v20, %v913_v7  ;;  %v1063_v27 = vpop.f32.mrf.mxu1  ;;  %v982_v32 = vpop.f32.mrf.mxu3  ;;  %v1508_v7 = vld [vmem:[#allocation3 + $0x128] sm:$0xff]  ;;  %1401 = vmatpush.msra.mxu3 %v1372_v10 }
 0x1f3   : > { %v1069_v29 = vadd.f32 %v1063_v27, %v1027_v22  ;;  %1532 = vmatpush.msra.mxu0 %v1508_v7 }
 0x1f4   : > { %v986_v55 = vadd.f32 %v982_v32, %v943_v23 }
 0x1f5   : > { %v2469_v34 = vadd.f32 %v2073_v21, %v1069_v29  ;;  %v1024_v43 = vpop.f32.mrf.mxu0  ;;  %1533 = vmatpush.msra.mxu0 %v1507_v9 }
 0x1f6   : > { %v1028_v45 = vadd.f32 %v1024_v43, %v986_v55 }
 0x1f7   : > { %v2472_v39 = vmul.f32 0.70710677, %v2469_v34  ;;  %1534 = vmatpush.msra.mxu0 %v1506_v16 }
 0x1f9   : > { %v2475_v46 = vand.u32 2147483647, %v2472_v39  ;;  %vm1490_vm5 = vcmp.lt.f32.partialorder %v2472_v39, 0.0 }
 0x1fa   : > { %v1066_v49 = vpop.f32.mrf.mxu1 }
 0x1fb   : > { %v1426_v1 = vmul.f32 0.3275911, %v2475_v46  ;;  %v1070_v50 = vadd.f32 %v1066_v49, %v1028_v45  ;;  %v1478_v30 = vsub.f32 0.0, %v2475_v46 }
 0x1fd   : > { %v1428_v53 = vadd.f32 1.0, %v1426_v1  ;;  %v2478_v54 = vadd.f32 %v2073_v21, %v1070_v50  ;;  %v1505_v21 = vld [vmem:[#allocation3 + $0x110] sm:$0xff]  ;;  %v1480_v35 = vmul.f32 %v1478_v30, %v2475_v46 }
 0x1fe   : > { %1535 = vmatpush.msra.mxu0 %v1505_v21 }
 0x1ff   : > { %2087 = vrcp.f32 %v1428_v53  ;;  %v2481_v60 = vmul.f32 0.70710677, %v2478_v54  ;;  %v1441_v14 = vand.u32 2147483648, %v1428_v53  ;;  %v1439_v18 = vand.u32 2147483647, %v1428_v53 }
 0x200   : > { %vm1435_vm13 = vweird.f32 %v1428_v53  ;;  %1536 = vmatpush.msra.mxu0 %v1504_v25  ;;  %v1482_v49 = vmul.f32 1.442695, %v1480_v35  ;;  %v1421_v30 = vmul.f32 0.5, %v2478_v54  ;;  %v1567_v35 = vld [vmem:[#allocation6 + $0x570] sm:$0xff]  ;;  %v1555_v54 = vld [vmem:[#allocation6 + $0x528] sm:$0xff] }
 0x201   : > { %v2484_v0 = vand.u32 2147483647, %v2481_v60  ;;  %v1442_v24 = vor.u32 1.1754944e-38, %v1441_v14  ;;  %vm1440_vm15 = vcmp.eq.f32.partialorder %v1439_v18, 8.507059e+37  ;;  %vm1491_vm6 = vcmp.lt.f32.partialorder %v2481_v60, 0.0  ;;  %v1566_v60 = vld [vmem:[#allocation6 + $0x568] sm:$0xff] }
 0x202   : > { %1537 = vmatpush.msra.mxu0 %v1503_v26 }
 0x203   : > { %v1427_v4 = vmul.f32 0.3275911, %v2484_v0  ;;  %v1479_v50 = vsub.f32 0.0, %v2484_v0 }
 0x205   : > { %v2088_v5 = vpop.eup %2087  ;;  %v1429_v8 = vadd.f32 1.0, %v1427_v4  ;;  %v1481_v57 = vmul.f32 %v1479_v50, %v2484_v0  ;;  %v1562_v50 = vld [vmem:[#allocation6 + $0x548] sm:$0xff] }
 0x206   : > { %v1431_v15 = vmul.f32 %v2088_v5, %v1428_v53  ;;  %vm1436_vm12 = vweird.f32 %v2088_v5 }
 0x207   : > { %2089 = vrcp.f32 %v1429_v8  ;;  %vm1437_vm14 = vmor %vm1435_vm13, %vm1436_vm12  ;;  %v1456_v55 = vand.u32 2147483648, %v1429_v8  ;;  %v1454_v37 = vand.u32 2147483647, %v1429_v8  ;;  %vm1450_vm2 = vweird.f32 %v1429_v8 }
 0x208   : > { %v1432_v11 = vsub.f32 1.0, %v1431_v15  ;;  %2091 = vpow2.f32 %v1482_v49  ;;  %v1484_v13 = vmul.f32 1.442695, %v1481_v57  ;;  %v1552_v49 = vld [vmem:[#allocation6 + $0x510] sm:$0xff]  ;;  %v1630_v57 = vld [vmem:[#allocation6 + $0x580] sm:$0xff] }
 0x209   : > { %v1457_v6 = vor.u32 1.1754944e-38, %v1456_v55  ;;  %vm1455_vm4 = vcmp.eq.f32.partialorder %v1454_v37, 8.507059e+37  ;;  %v1637_v55 = vld [vmem:[#allocation6 + $0x5b8] sm:$0xff]  ;;  %v1636_v37 = vld [vmem:[#allocation6 + $0x5b0] sm:$0xff] }
 0x20a   : > { %v1433_v17 = vmul.f32 %v2088_v5, %v1432_v11  ;;  %2093 = vpow2.f32 %v1484_v13 }
 0x20b   : > { %v1197_v20 = vpop.f32.mrf.mxu2 }
 0x20c   : > { %v1434_v22 = vadd.f32 %v2088_v5, %v1433_v17  ;;  %v1198_v23 = vadd.f32 %v2074_v12, %v1197_v20  ;;  %v1420_v20 = vmul.f32 0.5, %v2469_v34 }
 0x20d   : > { %v2090_v27 = vpop.eup %2089 }
 0x20e   : > { %v1438_v28 = vsel %vm1437_vm14, %v2088_v5, %v1434_v22  ;;  %1203 = vst.msk [vmem:[#allocation2 + $0x2] sm:$0xff] %vm331_vm0, %v1198_v23  ;;  %v1446_v31 = vmul.f32 %v2090_v27, %v1429_v8  ;;  %vm1451_vm1 = vweird.f32 %v2090_v27  ;;  %v2092_v15 = vpop.eup %2091 }
 0x20f   : > { %v1443_v29 = vsel %vm1440_vm15, %v1442_v24, %v1438_v28  ;;  %vm1452_vm3 = vmor %vm1450_vm2, %vm1451_vm1 }
 0x210   : > { %v1460_v19 = vmul.f32 1.0614054, %v1443_v29  ;;  %v1447_v32 = vsub.f32 1.0, %v1446_v31  ;;  %v2094_v23 = vpop.eup %2093 }
 0x212   : > { %v1462_v33 = vadd.f32 -1.4531521, %v1460_v19  ;;  %v1448_v36 = vmul.f32 %v2090_v27, %v1447_v32  ;;  %v1568_v32 = vld [vmem:[#allocation6 + $0x578] sm:$0xff] }
 0x213   : > { %v1200_v40 = vpop.f32.mrf.mxu2  ;;  %1583 = vmatpush.msra.mxu1 %v1568_v32 }
 0x214   : > { %v1464_v38 = vmul.f32 %v1462_v33, %v1443_v29  ;;  %v1201_v41 = vadd.f32 %v2074_v12, %v1200_v40  ;;  %v1449_v45 = vadd.f32 %v2090_v27, %v1448_v36  ;;  %v1557_v33 = vld [vmem:[#allocation6 + $0x538] sm:$0xff]  ;;  %v1556_v36 = vld [vmem:[#allocation6 + $0x530] sm:$0xff]  ;;  %v1565_v40 = vld [vmem:[#allocation6 + $0x560] sm:$0xff] }
 0x215   : > { %v1216_v42 = vld [vmem:[#allocation2 + $0x1] sm:$0xff]  ;;  %1612 = vmatpush.msrb.mxu2 %v1557_v33  ;;  %1584 = vmatpush.msra.mxu1 %v1567_v35 }
 0x216   : > { %v1205_v43 = vld [vmem:[#allocation2] sm:$0xff]  ;;  %v1466_v47 = vadd.f32 1.4214138, %v1464_v38  ;;  %1971 = vmatmul.msk.f32.vlgmr.msrb.gmra.mxu3 %vm331_vm0, %v1216_v42  ;;  %1204 = vst.msk [vmem:[#allocation2 + $0xa] sm:$0xff] %vm331_vm0, %v1201_v41  ;;  %v1453_v46 = vsel %vm1452_vm3, %v2090_v27, %v1449_v45  ;;  %v1554_v41 = vld [vmem:[#allocation6 + $0x520] sm:$0xff]  ;;  %v1633_v45 = vld [vmem:[#allocation6 + $0x598] sm:$0xff] }
 0x217   : > { %v1285_v44 = vld [vmem:[#allocation2 + $0x2] sm:$0xff]  ;;  %1973 = vmatmul.msk.f32.vlgmr.msrb.gmra.mxu0 %vm331_vm0, %v1205_v43  ;;  %v1458_v51 = vsel %vm1455_vm4, %v1457_v6, %v1453_v46  ;;  %1652 = vmatpush.msrb.mxu3 %v1637_v55  ;;  %v1634_v42 = vld [vmem:[#allocation6 + $0x5a0] sm:$0xff]  ;;  %v1564_v43 = vld [vmem:[#allocation6 + $0x558] sm:$0xff] }
 0x218   : > { %1975 = vmatmul.msk.f32.vlgmr.msrb.gmra.mxu1 %vm331_vm0, %v1285_v44  ;;  %v1468_v1 = vmul.f32 %v1466_v47, %v1443_v29  ;;  %v1461_v52 = vmul.f32 1.0614054, %v1458_v51  ;;  %1613 = vmatpush.msrb.mxu2 %v1556_v36  ;;  %v1635_v38 = vld [vmem:[#allocation6 + $0x5a8] sm:$0xff]  ;;  %v1553_v44 = vld [vmem:[#allocation6 + $0x518] sm:$0xff]  ;;  %v1563_v6 = vld [vmem:[#allocation6 + $0x550] sm:$0xff] }
 0x219   : > { %1653 = vmatpush.msrb.mxu3 %v1636_v37  ;;  %1585 = vmatpush.msra.mxu1 %v1566_v60  ;;  %v1679_v47 = vld [vmem:[#allocation6 + $0x5f8] sm:$0xff]  ;;  %v1632_v46 = vld [vmem:[#allocation6 + $0x590] sm:$0xff] }
 0x21a   : > { %v1470_v53 = vadd.f32 -0.28449672, %v1468_v1  ;;  %v1463_v62 = vadd.f32 -1.4531521, %v1461_v52  ;;  %1614 = vmatpush.msrb.mxu2 %v1555_v54  ;;  %1694 = vmatpush.msrb.mxu0 %v1679_v47  ;;  %v1678_v1 = vld [vmem:[#allocation6 + $0x5f0] sm:$0xff]  ;;  %v1631_v52 = vld [vmem:[#allocation6 + $0x588] sm:$0xff] }
 0x21b   : > { %1654 = vmatpush.msrb.mxu3 %v1635_v38  ;;  %1586 = vmatpush.msra.mxu1 %v1565_v40  ;;  %v1787_v38 = vld [vmem:[%s2640_s5 + $0x78] sm:$0xff]  ;;  %v1786_v40 = vld [vmem:[%s2640_s5 + $0x70] sm:$0xff] }
 0x21c   : > { %v1472_v56 = vmul.f32 %v1470_v53, %v1443_v29  ;;  %v1465_v59 = vmul.f32 %v1463_v62, %v1458_v51  ;;  %1615 = vmatpush.msrb.mxu2 %v1554_v41  ;;  %1695 = vmatpush.msrb.mxu0 %v1678_v1  ;;  %v1677_v53 = vld [vmem:[#allocation6 + $0x5e8] sm:$0xff]  ;;  %v1561_v62 = vld [vmem:[#allocation6 + $0x540] sm:$0xff]  ;;  %v1781_v1 = vld [vmem:[%s2640_s5 + $0x48] sm:$0xff] }
 0x21d   : > { %v1217_v63 = vld [vmem:[#allocation2 + $0x9] sm:$0xff]  ;;  %1655 = vmatpush.msrb.mxu3 %v1634_v42  ;;  %1587 = vmatpush.msra.mxu1 %v1564_v43  ;;  %v1784_v43 = vld [vmem:[%s2640_s5 + $0x60] sm:$0xff] }
 0x21e   : > { %v1474_v61 = vadd.f32 0.2548296, %v1472_v56  ;;  %v1206_v2 = vld [vmem:[#allocation2 + $0x8] sm:$0xff]  ;;  %1972 = vmatmul.msk.f32.gmra.mxu3 %vm331_vm0, %v1217_v63  ;;  %v1467_v5 = vadd.f32 1.4214138, %v1465_v59  ;;  %1616 = vmatpush.msrb.mxu2 %v1553_v44  ;;  %v1550_v56 = vld [vmem:[#allocation6 + $0x500] sm:$0xff] }
 0x21f   : > { %v1286_v3 = vld [vmem:[#allocation2 + $0xa] sm:$0xff]  ;;  %1974 = vmatmul.msk.f32.gmra.mxu0 %vm331_vm0, %v1206_v2  ;;  %1656 = vmatpush.msrb.mxu3 %v1633_v45  ;;  %v1783_v45 = vld [vmem:[%s2640_s5 + $0x58] sm:$0xff] }
 0x220   : > { %v1327_v4 = vld [vmem:[#allocation2 + $0x3] sm:$0xff]  ;;  %v1476_v7 = vmul.f32 %v1474_v61, %v1443_v29  ;;  %1976 = vmatmul.msk.f32.gmra.mxu1 %vm331_vm0, %v1286_v3  ;;  %v1469_v8 = vmul.f32 %v1467_v5, %v1458_v51  ;;  %v1328_v16 = vld [vmem:[#allocation2 + $0xb] sm:$0xff]  ;;  %1617 = vmatpush.msrb.mxu2 %v1552_v49  ;;  %v1676_v61 = vld [vmem:[#allocation6 + $0x5e0] sm:$0xff] }
 0x221   : > { %1977 = vmatmul.msk.f32.vlgmr.msra.gmra.mxu2 %vm331_vm0, %v1327_v4  ;;  %v1369_v14 = vld [vmem:[#allocation2 + $0x4] sm:$0xff]  ;;  %v1370_v28 = vld [vmem:[#allocation2 + $0xc] sm:$0xff]  ;;  %1588 = vmatpush.msra.mxu1 %v1563_v6 }
 0x222   : > { %v1486_v0 = vmul.f32 %v2092_v15, %v1476_v7  ;;  %v1471_v9 = vadd.f32 -0.28449672, %v1469_v8  ;;  %1657 = vmatpush.msrb.mxu3 %v1632_v46  ;;  %1696 = vmatpush.msrb.mxu0 %v1677_v53  ;;  %v1721_v63 = vld [vmem:[#allocation6 + $0x638] sm:$0xff]  ;;  %v1720_v4 = vld [vmem:[#allocation6 + $0x630] sm:$0xff]  ;;  %v1719_v15 = vld [vmem:[#allocation6 + $0x628] sm:$0xff] }
 0x223   : > { %1589 = vmatpush.msra.mxu1 %v1562_v50  ;;  %v1675_v2 = vld [vmem:[#allocation6 + $0x5d8] sm:$0xff]  ;;  %v1674_v7 = vld [vmem:[#allocation6 + $0x5d0] sm:$0xff]  ;;  %v1779_v53 = vld [vmem:[%s2640_s5 + $0x38] sm:$0xff] }
 0x224   : > { %v1488_v10 = vsub.f32 1.0, %v1486_v0  ;;  %v1473_v11 = vmul.f32 %v1471_v9, %v1458_v51  ;;  %1658 = vmatpush.msrb.mxu3 %v1631_v52  ;;  %1697 = vmatpush.msrb.mxu0 %v1676_v61  ;;  %v1673_v0 = vld [vmem:[#allocation6 + $0x5c8] sm:$0xff]  ;;  %v1718_v9 = vld [vmem:[#allocation6 + $0x620] sm:$0xff]  ;;  %v1785_v42 = vld [vmem:[%s2640_s5 + $0x68] sm:$0xff] }
 0x225   : > { %1590 = vmatpush.msra.mxu1 %v1561_v62  ;;  %v1782_v6 = vld [vmem:[%s2640_s5 + $0x50] sm:$0xff] }
 0x226   : > { %v1492_v12 = vsub.f32 0.0, %v1488_v10  ;;  %1979 = vmatmul.msk.f32.vlgmr.msra.gmra.mxu3 %vm331_vm0, %v1369_v14  ;;  %v1475_v17 = vadd.f32 0.2548296, %v1473_v11  ;;  %1698 = vmatpush.msrb.mxu0 %v1675_v2  ;;  %v1717_v11 = vld [vmem:[#allocation6 + $0x618] sm:$0xff] }
 0x227   : > { %1659 = vmatpush.msrb.mxu3 %v1630_v57  ;;  %1736 = vmatpush.msrb.mxu1 %v1721_v63  ;;  %v1778_v61 = vld [vmem:[%s2640_s5 + $0x30] sm:$0xff] }
 0x228   : > { %v1494_v18 = vsel %vm1490_vm5, %v1492_v12, %v1488_v10  ;;  %v1477_v22 = vmul.f32 %v1475_v17, %v1458_v51  ;;  %v1551_v51 = vld [vmem:[#allocation6 + $0x508] sm:$0xff]  ;;  %1699 = vmatpush.msrb.mxu0 %v1674_v7  ;;  %v1672_v10 = vld [vmem:[#allocation6 + $0x5c0] sm:$0xff]  ;;  %v1716_v12 = vld [vmem:[#allocation6 + $0x610] sm:$0xff] }
 0x229   : > { %1978 = vmatmul.msk.f32.gmra.mxu2 %vm331_vm0, %v1328_v16  ;;  %v1496_v21 = vadd.f32 1.0, %v1494_v18  ;;  %1737 = vmatpush.msrb.mxu1 %v1720_v4 }
 0x22a   : > { %v1487_v25 = vmul.f32 %v2094_v23, %v1477_v22  ;;  %1618 = vmatpush.msrb.mxu2 %v1551_v51  ;;  %1700 = vmatpush.msrb.mxu0 %v1673_v0  ;;  %v1714_v22 = vld [vmem:[#allocation6 + $0x600] sm:$0xff]  ;;  %v2076_v23 = vld [vmem:[%s2637_s2 + $0x4] ss:$0 sm:$0xff] }
 0x22b   : > { %v1498_v24 = vmul.f32 %v1496_v21, %v1420_v20  ;;  %1738 = vmatpush.msrb.mxu1 %v1719_v15  ;;  %v1715_v20 = vld [vmem:[#allocation6 + $0x608] sm:$0xff] }
 0x22c   : > { %v1489_v27 = vsub.f32 1.0, %v1487_v25  ;;  %1619 = vmatpush.msrb.mxu2 %v1550_v56  ;;  %1701 = vmatpush.msrb.mxu0 %v1672_v10  ;;  %v1780_v51 = vld [vmem:[%s2640_s5 + $0x40] sm:$0xff]  ;;  %v1774_v10 = vld [vmem:[%s2640_s5 + $0x10] sm:$0xff] }
 0x22d   : > { %v1500_v26 = vmul.f32 %v1498_v24, %v2456_v48  ;;  %1739 = vmatpush.msrb.mxu1 %v1718_v9 }
 0x22e   : > { %1980 = vmatmul.msk.f32.gmra.mxu3 %vm331_vm0, %v1370_v28  ;;  %v1493_v39 = vsub.f32 0.0, %v1489_v27  ;;  %1792 = vmatpush.msra.mxu2 %v1787_v38 }
 0x22f   : > { %1983 = vmatmul.msk.f32.vlgmr.msra.gmra.mxu0 %vm331_vm0, %v1500_v26  ;;  %1740 = vmatpush.msrb.mxu1 %v1717_v11 }
 0x230   : > { %v1495_v29 = vsel %vm1491_vm6, %v1493_v39, %v1489_v27  ;;  %1793 = vmatpush.msra.mxu2 %v1786_v40 }
 0x231   : > { %v1497_v34 = vadd.f32 1.0, %v1495_v29  ;;  %1741 = vmatpush.msrb.mxu1 %v1716_v12 }
 0x232   : > { %1794 = vmatpush.msra.mxu2 %v1785_v42 }
 0x233   : > { %v1499_v31 = vmul.f32 %v1497_v34, %v1421_v30  ;;  %1742 = vmatpush.msrb.mxu1 %v1715_v20  ;;  %v1772_v20 = vld [vmem:[%s2640_s5] sm:$0xff] }
 0x234   : > { %1795 = vmatpush.msra.mxu2 %v1784_v43 }
 0x235   : > { %v1501_v19 = vmul.f32 %v1499_v31, %v2462_v58  ;;  %1743 = vmatpush.msrb.mxu1 %v1714_v22 }
 0x236   : > { %1796 = vmatpush.msra.mxu2 %v1783_v45 }
 0x237   : > { %1984 = vmatmul.msk.f32.gmra.mxu0 %vm331_vm0, %v1501_v19 }
 0x238   : > { %1797 = vmatpush.msra.mxu2 %v1782_v6 }
 0x23a   : > { %1798 = vmatpush.msra.mxu2 %v1781_v1 }
 0x23c   : > { %1799 = vmatpush.msra.mxu2 %v1780_v51 }
 0x23e   : > { %1800 = vmatpush.msra.mxu2 %v1779_v53 }
 0x240   : > { %1801 = vmatpush.msra.mxu2 %v1778_v61 }
 0x294   : > { %v1279_v59 = vpop.f32.mrf.mxu0 }
 0x295   : > { %v1319_v13 = vpop.f32.mrf.mxu1 }
 0x299   : > { %v1250_v3 = vpop.f32.mrf.mxu3 }
 0x29a   : > { %v1280_v5 = vadd.f32 %v1279_v59, %v1250_v3  ;;  %v2077_v59 = vld [vmem:[%s2639_s4 + $0x4] ss:$0 sm:$0xff]  ;;  %v1777_v3 = vld [vmem:[%s2640_s5 + $0x28] sm:$0xff] }
 0x29b   : > { %1802 = vmatpush.msra.mxu2 %v1777_v3 }
 0x29c   : > { %v1325_v8 = vadd.f32 %v1319_v13, %v1280_v5  ;;  %v1282_v14 = vpop.f32.mrf.mxu0  ;;  %v1776_v13 = vld [vmem:[%s2640_s5 + $0x20] sm:$0xff] }
 0x29d   : > { %v1322_v37 = vpop.f32.mrf.mxu1  ;;  %1803 = vmatpush.msra.mxu2 %v1776_v13 }
 0x2a1   : > { %v1253_v16 = vpop.f32.mrf.mxu3 }
 0x2a2   : > { %v2514_v17 = vadd.f32 %v1282_v14, %v1253_v16  ;;  %v1773_v14 = vld [vmem:[%s2640_s5 + $0x8] sm:$0xff] }
 0x2a4   : > { %v1361_v18 = vpop.f32.mrf.mxu2  ;;  %v1326_v22 = vadd.f32 %v1322_v37, %v2514_v17  ;;  %v2078_v17 = vld [vmem:[%s2641_s6] ss:$0 sm:$0xff] }
 0x2a5   : > { %v1367_v21 = vadd.f32 %v1361_v18, %v1325_v8  ;;  %v1775_v8 = vld [vmem:[%s2640_s5 + $0x18] sm:$0xff] }
 0x2a6   : > { %1804 = vmatpush.msra.mxu2 %v1775_v8 }
 0x2a8   : > { %1805 = vmatpush.msra.mxu2 %v1774_v10 }
 0x2a9   : > { %v1403_v24 = vpop.f32.mrf.mxu3 }
 0x2aa   : > { %v2519_v25 = vadd.f32 %v1403_v24, %v1367_v21  ;;  %1806 = vmatpush.msra.mxu2 %v1773_v14  ;;  %v2075_v21 = vld [vmem:[%s2639_s4 + $0x3] ss:$0 sm:$0xff] }
 0x2ac   : > { %v1539_v26 = vpop.f32.mrf.mxu0  ;;  %v2533_v60 = vpop.f32.mrf.mxu2  ;;  %1807 = vmatpush.msra.mxu2 %v1772_v20 }
 0x2ad   : > { %v1540_v27 = vadd.f32 %v2076_v23, %v1539_v26  ;;  %v1368_v24 = vadd.f32 %v2533_v60, %v1326_v22 }
 0x2af   : > { %1545 = vst.msk [vmem:[#allocation2 + $0x2] sm:$0xff] %vm331_vm0, %v1540_v27 }
 0x2b1   : > { %v1406_v41 = vpop.f32.mrf.mxu3 }
 0x2b2   : > { %v1410_v27 = vadd.f32 %v1406_v41, %v1368_v24 }
 0x2b4   : > { %v1542_v28 = vpop.f32.mrf.mxu0 }
 0x2b5   : > { %v1543_v39 = vadd.f32 %v2076_v23, %v1542_v28  ;;  %v1416_v23 = vadd.f32 %v2075_v21, %v2519_v25 }
 0x2b6   : > { %v1558_v29 = vld [vmem:[#allocation2 + $0x1] sm:$0xff] }
 0x2b7   : > { %v1547_v30 = vld [vmem:[#allocation2] sm:$0xff]  ;;  %1985 = vmatmul.msk.f32.vlgmr.msra.gmra.mxu1 %vm331_vm0, %v1558_v29  ;;  %1546 = vst.msk [vmem:[#allocation2 + $0xa] sm:$0xff] %vm331_vm0, %v1543_v39  ;;  %v1418_v26 = vadd.f32 %v1416_v23, %v2456_v48  ;;  %v1417_v29 = vadd.f32 %v2075_v21, %v1410_v27 }
 0x2b8   : > { %v1627_v34 = vld [vmem:[#allocation2 + $0x2] sm:$0xff]  ;;  %1987 = vmatmul.msk.f32.vlgmr.msrb.gmra.mxu2 %vm331_vm0, %v1547_v30 }
 0x2b9   : > { %1989 = vmatmul.msk.f32.vlgmr.msrb.gmra.mxu3 %vm331_vm0, %v1627_v34  ;;  %v1419_v30 = vadd.f32 %v1417_v29, %v2462_v58 }
 0x2be   : > { %v1559_v31 = vld [vmem:[#allocation2 + $0x9] sm:$0xff] }
 0x2bf   : > { %v1548_v19 = vld [vmem:[#allocation2 + $0x8] sm:$0xff]  ;;  %1986 = vmatmul.msk.f32.gmra.mxu1 %vm331_vm0, %v1559_v31 }
 0x2c0   : > { %v1628_v32 = vld [vmem:[#allocation2 + $0xa] sm:$0xff]  ;;  %1988 = vmatmul.msk.f32.gmra.mxu2 %vm331_vm0, %v1548_v19 }
 0x2c1   : > { %v1669_v33 = vld [vmem:[#allocation2 + $0x3] sm:$0xff]  ;;  %1990 = vmatmul.msk.f32.gmra.mxu3 %vm331_vm0, %v1628_v32  ;;  %v1670_v35 = vld [vmem:[#allocation2 + $0xb] sm:$0xff] }
 0x2c2   : > { %1991 = vmatmul.msk.f32.vlgmr.msrb.gmra.mxu0 %vm331_vm0, %v1669_v33  ;;  %v1711_v55 = vld [vmem:[#allocation2 + $0x4] sm:$0xff]  ;;  %v1712_v36 = vld [vmem:[#allocation2 + $0xc] sm:$0xff] }
 0x2c7   : > { %1993 = vmatmul.msk.f32.vlgmr.msrb.gmra.mxu1 %vm331_vm0, %v1711_v55 }
 0x2ca   : > { %1992 = vmatmul.msk.f32.gmra.mxu0 %vm331_vm0, %v1670_v35 }
 0x2cf   : > { %1994 = vmatmul.msk.f32.gmra.mxu1 %vm331_vm0, %v1712_v36 }
 0x334   : > { %v1592_v54 = vpop.f32.mrf.mxu1 }
 0x33b   : > { %v1621_v44 = vpop.f32.mrf.mxu2 }
 0x33c   : > { %v1622_v47 = vadd.f32 %v1621_v44, %v1592_v54  ;;  %v1661_v49 = vpop.f32.mrf.mxu3  ;;  %v1595_v46 = vpop.f32.mrf.mxu1 }
 0x33e   : > { %v1667_v50 = vadd.f32 %v1661_v49, %v1622_v47 }
 0x33f   : > { %v1703_v52 = vpop.f32.mrf.mxu0 }
 0x340   : > { %v1709_v56 = vadd.f32 %v1703_v52, %v1667_v50 }
 0x343   : > { %v1624_v62 = vpop.f32.mrf.mxu2 }
 0x344   : > { %v1625_v57 = vadd.f32 %v1624_v62, %v1595_v46  ;;  %v1745_v63 = vpop.f32.mrf.mxu1  ;;  %v1664_v4 = vpop.f32.mrf.mxu3 }
 0x345   : > { %v1751_v2 = vadd.f32 %v1745_v63, %v1709_v56 }
 0x346   : > { %v1668_v5 = vadd.f32 %v1664_v4, %v1625_v57 }
 0x347   : > { %v1758_v7 = vadd.f32 %v2077_v59, %v1751_v2  ;;  %v1706_v0 = vpop.f32.mrf.mxu0 }
 0x348   : > { %v1710_v9 = vadd.f32 %v1706_v0, %v1668_v5 }
 0x349   : > { %v1760_v15 = vadd.f32 %v1758_v7, %v2456_v48 }
 0x34b   : > { %1764 = vrot.lane.b32.xlu0 %v1760_v15, %s2232_s19 }
 0x34c   : > { %v1748_v11 = vpop.f32.mrf.mxu1 }
 0x34d   : > { %v1752_v12 = vadd.f32 %v1748_v11, %v1710_v9 }
 0x34f   : > { %v1759_v16 = vadd.f32 %v2077_v59, %v1752_v12 }
 0x351   : > { %v1761_v18 = vadd.f32 %v1759_v16, %v2462_v58 }
 0x353   : > { %1766 = vrot.lane.b32.xlu0 %v1761_v18, %s2232_s19  ;;  %s306_s19 = scalar_lea.vmem [#allocation8], %s1925_s15 }
 0x354   : > { %s1830_s23 = sshll.u32 %s306_s19, 4  ;;  %s1831_s23 = int_to_ptr.vmem [resolvable:$true] %s1830_s23 }
 0x3bd   : > { %v1765_v28 = vpop.permute.xlu0 %1764 }
 0x3be   : > { %v1770_v39 = vsel %vm331_vm0, %v1418_v26, %v1765_v28 }
 0x3bf   : > { %1808 = vmatmul.f32.vlgmr.msra.gmra.mxu2 %v1770_v39 }
 0x3c5   : > { %v1767_v34 = vpop.permute.xlu0 %1766 }
 0x3c6   : > { %v1771_v31 = vsel %vm331_vm0, %v1419_v30, %v1767_v34 }
 0x3c7   : > { %1811 = vmatmul.f32.gmra.mxu2 %v1771_v31 }
 0x442   : > { %v1809_v25 = vpop.f32.mrf.mxu2 }
 0x443   : > { %v1810_v48 = vadd.f32 %v2078_v17, %v1809_v25 }
 0x445   : > { %1815 = vst.msk [vmem:[%s306_s19] sm:$0xff] %vm331_vm0, %v1810_v48 }
 0x44a   : > { %v1812_v58 = vpop.f32.mrf.mxu2 }
 0x44b   : > { %v1813_v19 = vadd.f32 %v2078_v17, %v1812_v58 }
 0x44d   : > { %1816 = vst.msk [vmem:[%s306_s19 + $0x8] sm:$0xff] %vm331_vm0, %v1813_v19 }
 0x44e   : > { %2182 = shalt.err (!%p2179_p8)
}
 0x44f   : > { %s2233_s14 = smov 128   ;;  %s2234_s19 = smov 8  }
 0x450   : > { %2010 = dma.vmem_to_hbm [thread:$0]  (%p2313_p5), %s1831_s23, 256, %s1833_s29, %s1818_s8, %s2233_s14, %s2233_s14, %s2234_s19  }
 0x451 PF: > { %p2027_p9 = scmp.ge.s32.totalorder %s2225_s27, 2  ;;  %s1847_s20 = sand.u32 1, %s2213_s24  }
 0x452   : > { %s1848_s21 = scalar_lea.sflag [#allocation5], %s1847_s20 }
 0x453   : > { %p2020_p10 = pnand %p2027_p9, %p2317_p6 }
 0x455   : > { %p2021_p11 = pneg %p2020_p10 }
 0x457   : > { %2208 = dma.done.wait (%p2021_p11), %s1848_s21, 256  }
 0x458   : > { %2210 = vsyncadd (%p2021_p11), %s1848_s21, 4294967040  ;;  %p19_p12 = scmp.ge.s32.totalorder %s2300_s30, 4   ;;  %s2646_s24 = smov %s2217_s25 }
 0x459   : > { %s2647_s25 = smov %s2221_s26  ;;  %s2648_s26 = smov %s2311_s10 }
 0x45a   : > { %s2649_s27 = smov %s2300_s30  ;;  %21 = sbr.rel (!%p19_p12) target bundleno = 5 (0x5), region = 128 }
 0x45f   :  { %1854 = vsyncpa [#allocation4], 1 }
 0x460   :  { %1856 = vsyncpa [#allocation4 + $0x1], 1 }
 0x461   :  { %1857 = vsyncpa [#allocation7], 1 }
 0x462   :  { %1858 = vsyncpa [#allocation5], 1 }
 0x463   :  { %1860 = vsyncpa [#allocation5 + $0x1], 1 }

</bundles_post_ra>
